<compile_context>
chip_gen: v7x
topology: tpu7x:2x2x1
jax: 0.10.0
libtpu: 0.0.40
codegen_flags: <defaults>
</compile_context>

<pallas_src>
import math
import functools

import jax
import jax.numpy as jnp
from jax import lax
from jax.experimental import pallas as pl
from jax.experimental.pallas import tpu as pltpu


def _layernorm(x, gamma, beta, eps=1e-5):
    mu = jnp.mean(x, axis=-1, keepdims=True)
    var = jnp.mean((x - mu) ** 2, axis=-1, keepdims=True)
    return (x - mu) * lax.rsqrt(var + eps) * gamma + beta


def encoder_kernel(x_hbm_ref,
                   wqkv_ref, wo_ref, bo_ref,
                   g1_ref, be1_ref,
                   w1_ref, fb1_ref, w2_ref, fb2_ref,
                   g2_ref, be2_ref,
                   o_ref,
                   copy_sem,
                   *, batch, seq, heads):
    layer = pl.program_id(0)
    BS, D = o_ref.shape
    hd = D // heads
    scale = 1.0 / math.sqrt(hd)

    # Layer 0: DMA the embedded activations straight from HBM into the resident
    # output block (no second full-size [BS,D] f32 VMEM buffer pinned for the
    # whole kernel).
    @pl.when(layer == 0)
    def _():
        cp = pltpu.make_async_copy(x_hbm_ref, o_ref, copy_sem)
        cp.start()
        cp.wait()

    x = o_ref[...]                                    # [BS, D] f32, resident
    xb = x.astype(jnp.bfloat16)

    # ---- fused QKV projection: one lane-dense [BS,D]x[D,3D] MXU matmul ----
    qkv = jnp.dot(xb, wqkv_ref[0], preferred_element_type=jnp.float32)  # [BS,3D]
    # one sublane-aligned f32 reshape + ONE hoisted bf16 cast (not per head)
    qkv3 = qkv.reshape(batch, seq, 3 * D).astype(jnp.bfloat16)          # [B,S,3D]

    # attention accumulator seeded with the fc_out bias (single broadcast)
    attn = jnp.broadcast_to(bo_ref[0], (BS, D)).astype(jnp.float32)

    # ---- scaled dot-product attention: loop over heads only; the batch dim is
    # handled by batched dot_general (no per-(b,h) unroll, no ctx VMEM scratch)
    for h in range(heads):
        c0 = h * hd
        qh = qkv3[:, :, c0:c0 + hd]                     # [B, S, hd] bf16
        kh = qkv3[:, :, D + c0:D + c0 + hd]
        vh = qkv3[:, :, 2 * D + c0:2 * D + c0 + hd]
        s = lax.dot_general(qh, kh, (((2,), (2,)), ((0,), (0,))),
                            preferred_element_type=jnp.float32) * scale  # [B,S,S]
        s = s - jnp.max(s, axis=-1, keepdims=True)
        p = jnp.exp(s)
        p = p / jnp.sum(p, axis=-1, keepdims=True)      # exact softmax (f32)
        ch = lax.dot_general(p.astype(jnp.bfloat16), vh,
                             (((2,), (1,)), ((0,), (0,))),
                             preferred_element_type=jnp.float32)         # [B,S,hd]
        # fold this head's slice of fc_out directly:
        #   fc_out(concat_h ctx_h) == sum_h ctx_h @ Wo_h  (+ bias)
        ch2 = ch.reshape(BS, hd).astype(jnp.bfloat16)
        attn = attn + jnp.dot(ch2, wo_ref[0, h],
                              preferred_element_type=jnp.float32)        # [BS,D]

    # Residual + LayerNorm 1 (f32 elementwise)
    h1 = _layernorm(x + attn, g1_ref[0], be1_ref[0])

    # Position-wise feed-forward (pre-transposed weights, bf16 MXU operands)
    ff = jnp.dot(h1.astype(jnp.bfloat16), w1_ref[0],
                 preferred_element_type=jnp.float32) + fb1_ref[0]
    ff = jnp.maximum(ff, 0.0)
    ff = jnp.dot(ff.astype(jnp.bfloat16), w2_ref[0],
                 preferred_element_type=jnp.float32) + fb2_ref[0]

    # Residual + LayerNorm 2 -> next layer's input; stays resident in VMEM and
    # is written back to HBM only after the final layer iteration.
    o_ref[...] = _layernorm(h1 + ff, g2_ref[0], be2_ref[0])


def encoder_pallas(x2, stacked, *, batch, seq, heads, n_layers):
    """x2: [B*S, D] float32 activations; stacked: dict of [L, ...] params."""
    BS, D = x2.shape

    def wspec(arr):
        nd = arr.ndim
        blk = (1,) + arr.shape[1:]
        return pl.BlockSpec(blk, lambda l, _nd=nd: (l,) + (0,) * (_nd - 1))

    in_specs = [
        pl.BlockSpec(memory_space=pl.ANY),   # activations stay in HBM; one DMA
        wspec(stacked["wqkv"]), wspec(stacked["wo"]), wspec(stacked["bo"]),
        wspec(stacked["g1"]), wspec(stacked["be1"]),
        wspec(stacked["w1"]), wspec(stacked["fb1"]),
        wspec(stacked["w2"]), wspec(stacked["fb2"]),
        wspec(stacked["g2"]), wspec(stacked["be2"]),
    ]

    return pl.pallas_call(
        functools.partial(encoder_kernel, batch=batch, seq=seq, heads=heads),
        out_shape=jax.ShapeDtypeStruct((BS, D), jnp.float32),
        grid_spec=pltpu.PrefetchScalarGridSpec(
            num_scalar_prefetch=0,
            grid=(n_layers,),
            in_specs=in_specs,
            out_specs=pl.BlockSpec((BS, D), lambda l: (0, 0)),
            scratch_shapes=[pltpu.SemaphoreType.DMA(())]),
        compiler_params=pltpu.CompilerParams(
            dimension_semantics=("arbitrary",),
            vmem_limit_bytes=32 * 1024 * 1024),
    )(x2,
      stacked["wqkv"], stacked["wo"], stacked["bo"],
      stacked["g1"], stacked["be1"],
      stacked["w1"], stacked["fb1"], stacked["w2"], stacked["fb2"],
      stacked["g2"], stacked["be2"])


def init_params(key, vocab, max_len, embed, heads, hidden, n_layers):
    hd = embed // heads
    assert hd * heads == embed, "Embed size must be divisible by heads"
    keys = jax.random.split(key, 2 + n_layers)
    tok_emb = jax.random.normal(keys[0], (vocab, embed), jnp.float32) * 0.02
    pos_emb = jax.random.normal(keys[1], (max_len, embed), jnp.float32) * 0.02

    eye = jnp.eye(heads, dtype=jnp.float32)
    raw_layers, packed_layers = [], []
    for i in range(n_layers):
        ks = jax.random.split(keys[2 + i], 6)
        # Reference has three distinct Linear(hd, hd, bias=False) layers, each
        # shared across heads.
        wq = jax.random.normal(ks[0], (hd, hd), jnp.float32) / math.sqrt(hd)
        wk = jax.random.normal(ks[1], (hd, hd), jnp.float32) / math.sqrt(hd)
        wv = jax.random.normal(ks[2], (hd, hd), jnp.float32) / math.sqrt(hd)
        wo = jax.random.normal(ks[3], (embed, embed), jnp.float32) / math.sqrt(embed)
        w1 = jax.random.normal(ks[4], (hidden, embed), jnp.float32) / math.sqrt(embed)
        w2 = jax.random.normal(ks[5], (embed, hidden), jnp.float32) / math.sqrt(hidden)
        raw_layers.append(dict(wq=wq, wk=wk, wv=wv, wo=wo, w1=w1, w2=w2))

        # fused, block-diagonal, pre-transposed QKV weight (D <= 128 only)
        wqkv = jnp.concatenate(
            [jnp.kron(eye, wq.T), jnp.kron(eye, wk.T), jnp.kron(eye, wv.T)],
            axis=1)                                              # [D, 3D]
        packed_layers.append(dict(
            wqkv=wqkv.astype(jnp.bfloat16),
            wo=wo.T.reshape(heads, hd, embed).astype(jnp.bfloat16),  # [H, hd, D]
            bo=jnp.zeros((1, embed), jnp.float32),
            g1=jnp.ones((1, embed), jnp.float32),
            be1=jnp.zeros((1, embed), jnp.float32),
            w1=w1.T.astype(jnp.bfloat16),                        # [D, hidden]
            fb1=jnp.zeros((1, hidden), jnp.float32),
            w2=w2.T.astype(jnp.bfloat16),                        # [hidden, D]
            fb2=jnp.zeros((1, embed), jnp.float32),
            g2=jnp.ones((1, embed), jnp.float32),
            be2=jnp.zeros((1, embed), jnp.float32),
        ))
    stacked = {name: jnp.stack([p[name] for p in packed_layers], axis=0)
               for name in packed_layers[0]}
    return tok_emb, pos_emb, stacked, raw_layers


def encoder_forward(tokens, tok_emb, pos_emb, stacked, heads, n_layers):
    B, S = tokens.shape
    D = tok_emb.shape[-1]
    # TransformerEmbedding: token + positional embedding (dropout = identity)
    x = tok_emb[tokens] + pos_emb[None, :S, :]       # [B, S, D]
    x2 = x.reshape(B * S, D)                         # rows = B*S, lanes = D
    out = encoder_pallas(x2, stacked, batch=B, seq=S, heads=heads,
                         n_layers=n_layers)
    return out.reshape(B, S, D)


# ----- pure-JAX f32 reference (mirrors the PyTorch module) -----
def _ref_layernorm(x, eps=1e-5):
    mu = jnp.mean(x, axis=-1, keepdims=True)
    var = jnp.mean((x - mu) ** 2, axis=-1, keepdims=True)
    return (x - mu) / jnp.sqrt(var + eps)


def reference_forward(tokens, tok_emb, pos_emb, raw_layers, heads):
    B, S = tokens.shape
    D = tok_emb.shape[-1]
    hd = D // heads
    x = tok_emb[tokens] + pos_emb[None, :S, :]       # [B, S, D]
    for p in raw_layers:
        xs = x.reshape(B, S, heads, hd)
        q = (xs @ p["wq"].T).transpose(0, 2, 1, 3)   # [B, H, S, hd]
        k = (xs @ p["wk"].T).transpose(0, 2, 1, 3)
        v = (xs @ p["wv"].T).transpose(0, 2, 1, 3)
        s = jnp.einsum("bhqd,bhkd->bhqk", q, k) / math.sqrt(hd)
        a = jax.nn.softmax(s, axis=-1)
        ctx = jnp.einsum("bhqk,bhkd->bhqd", a, v)
        ctx = ctx.transpose(0, 2, 1, 3).reshape(B, S, D)
        attn = ctx @ p["wo"].T                       # fc_out (zero bias)
        h1 = _ref_layernorm(x + attn)
        ff = jax.nn.relu(h1 @ p["w1"].T) @ p["w2"].T
        x = _ref_layernorm(h1 + ff)
    return x


if __name__ == "__main__":
    enc_voc_size = 50
    max_len = 16
    embed_size = 32
    heads = 4
    hidden = 64
    n_layers = 2
    batch, seq = 2, 8

    key = jax.random.PRNGKey(0)
    k_tok, k_param = jax.random.split(key)

    tokens = jax.random.randint(k_tok, (batch, seq), 0, enc_voc_size, jnp.int32)
    tok_emb, pos_emb, stacked, raw_layers = init_params(
        k_param, enc_voc_size, max_len, embed_size, heads, hidden, n_layers)

    out = encoder_forward(tokens, tok_emb, pos_emb, stacked, heads, n_layers)
    out = jax.block_until_ready(out)

    assert out.shape == (batch, seq, embed_size)
    assert bool(jnp.all(jnp.isfinite(out)))
    # loose tolerance: kernel uses bf16 MXU operands (f32 accumulation/elementwise)
    ref = reference_forward(tokens, tok_emb, pos_emb, raw_layers, heads)
    assert float(jnp.max(jnp.abs(out - ref))) < 0.15
    print("KERNEL_OK")
</pallas_src>

<mosaic_0001>
module attributes {stable_mosaic.version = 11 : i64} {
  func.func @encoder_kernel(%arg0: i32, %arg1: memref<16x32xf32, #tpu.memory_space<any>>, %arg2: memref<1x32x96xbf16, #tpu.memory_space<vmem>>, %arg3: memref<1x4x8x32xbf16, #tpu.memory_space<vmem>>, %arg4: memref<1x1x32xf32, #tpu.memory_space<vmem>>, %arg5: memref<1x1x32xf32, #tpu.memory_space<vmem>>, %arg6: memref<1x1x32xf32, #tpu.memory_space<vmem>>, %arg7: memref<1x32x64xbf16, #tpu.memory_space<vmem>>, %arg8: memref<1x1x64xf32, #tpu.memory_space<vmem>>, %arg9: memref<1x64x32xbf16, #tpu.memory_space<vmem>>, %arg10: memref<1x1x32xf32, #tpu.memory_space<vmem>>, %arg11: memref<1x1x32xf32, #tpu.memory_space<vmem>>, %arg12: memref<1x1x32xf32, #tpu.memory_space<vmem>>, %arg13: memref<16x32xf32, #tpu.memory_space<vmem>>, %arg14: memref<!tpu.dma_semaphore, #tpu.memory_space<semaphore_mem>>) attributes {dimension_semantics = [#tpu.dimension_semantics<arbitrary>], iteration_bounds = array<i64: 2>, scalar_prefetch = 0 : i64, scratch_operands = 1 : i64, tpu.core_type = #tpu.core_type<tc>, window_params = [{}, {transform_indices = @transform_1, window_bounds = array<i64: 1, 32, 96>}, {transform_indices = @transform_2, window_bounds = array<i64: 1, 4, 8, 32>}, {transform_indices = @transform_3, window_bounds = array<i64: 1, 1, 32>}, {transform_indices = @transform_4, window_bounds = array<i64: 1, 1, 32>}, {transform_indices = @transform_5, window_bounds = array<i64: 1, 1, 32>}, {transform_indices = @transform_6, window_bounds = array<i64: 1, 32, 64>}, {transform_indices = @transform_7, window_bounds = array<i64: 1, 1, 64>}, {transform_indices = @transform_8, window_bounds = array<i64: 1, 64, 32>}, {transform_indices = @transform_9, window_bounds = array<i64: 1, 1, 32>}, {transform_indices = @transform_10, window_bounds = array<i64: 1, 1, 32>}, {transform_indices = @transform_11, window_bounds = array<i64: 1, 1, 32>}, {pipeline_mode = #tpu.pipeline_mode<synchronous>, transform_indices = @transform_12, window_bounds = array<i64: 16, 32>}]} {
    %c0_i32 = arith.constant 0 : i32
    %0 = arith.cmpi eq, %arg0, %c0_i32 : i32
    %1 = arith.extui %0 : i1 to i32
    %c0_i32_0 = arith.constant 0 : i32
    %2 = arith.cmpi ne, %1, %c0_i32_0 : i32
    scf.if %2 {
      tpu.enqueue_dma source(%arg1 : memref<16x32xf32, #tpu.memory_space<any>>) target(%arg13 : memref<16x32xf32, #tpu.memory_space<vmem>>) target_semaphore(%arg14 : memref<!tpu.dma_semaphore, #tpu.memory_space<semaphore_mem>>)
      tpu.wait_dma2 semaphore(%arg14 : memref<!tpu.dma_semaphore, #tpu.memory_space<semaphore_mem>>) src(%arg1 : memref<16x32xf32, #tpu.memory_space<any>>) dst(%arg13 : memref<16x32xf32, #tpu.memory_space<vmem>>)
    } else {
    }
    %c0 = arith.constant 0 : index
    %c0_1 = arith.constant 0 : index
    %3 = vector.load %arg13[%c0, %c0_1] : memref<16x32xf32, #tpu.memory_space<vmem>>, vector<16x32xf32>
    %4 = arith.truncf %3 : vector<16x32xf32> to vector<16x32xbf16>
    %c0_2 = arith.constant 0 : index
    %c0_3 = arith.constant 0 : index
    %c0_4 = arith.constant 0 : index
    %5 = vector.load %arg2[%c0_2, %c0_3, %c0_4] : memref<1x32x96xbf16, #tpu.memory_space<vmem>>, vector<1x32x96xbf16>
    %6 = vector.shape_cast %5 : vector<1x32x96xbf16> to vector<32x96xbf16>
    %cst = arith.constant dense<0.000000e+00> : vector<16x96xf32>
    %7 = tpu.matmul %4, %6, %cst {dimension_numbers = #tpu.dot_dimension_numbers<[1], [0], [0], [1], [0, 0, 1, 1], [], []>} : vector<16x32xbf16>, vector<32x96xbf16>, vector<16x96xf32> -> vector<16x96xf32>
    %8 = vector.shape_cast %7 : vector<16x96xf32> to vector<2x8x96xf32>
    %9 = arith.truncf %8 : vector<2x8x96xf32> to vector<2x8x96xbf16>
    %c0_5 = arith.constant 0 : index
    %c0_6 = arith.constant 0 : index
    %c0_7 = arith.constant 0 : index
    %10 = vector.load %arg4[%c0_5, %c0_6, %c0_7] : memref<1x1x32xf32, #tpu.memory_space<vmem>>, vector<1x1x32xf32>
    %11 = vector.shape_cast %10 : vector<1x1x32xf32> to vector<1x32xf32>
    %12 = vector.shape_cast %11 : vector<1x32xf32> to vector<1x32xf32>
    %13 = vector.broadcast %12 : vector<1x32xf32> to vector<16x32xf32>
    %14 = vector.extract_strided_slice %9 {offsets = [0, 0, 0], sizes = [2, 8, 8], strides = [1, 1, 1]} : vector<2x8x96xbf16> to vector<2x8x8xbf16>
    %15 = vector.extract_strided_slice %9 {offsets = [0, 0, 32], sizes = [2, 8, 8], strides = [1, 1, 1]} : vector<2x8x96xbf16> to vector<2x8x8xbf16>
    %16 = vector.extract_strided_slice %9 {offsets = [0, 0, 64], sizes = [2, 8, 8], strides = [1, 1, 1]} : vector<2x8x96xbf16> to vector<2x8x8xbf16>
    %cst_8 = arith.constant dense<0.000000e+00> : vector<2x8x8xf32>
    %17 = tpu.matmul %14, %15, %cst_8 {dimension_numbers = #tpu.dot_dimension_numbers<[2], [2], [1], [1], [0, 0, 0, 1, 1, 1], [0], [0]>} : vector<2x8x8xbf16>, vector<2x8x8xbf16>, vector<2x8x8xf32> -> vector<2x8x8xf32>
    %cst_9 = arith.constant 0.353553385 : f32
    %18 = vector.broadcast %cst_9 : f32 to vector<2x8x8xf32>
    %19 = arith.mulf %17, %18 : vector<2x8x8xf32>
    %cst_10 = arith.constant dense<0xFF800000> : vector<2x8xf32>
    %20 = vector.multi_reduction <maximumf>, %19, %cst_10 [2] : vector<2x8x8xf32> to vector<2x8xf32>
    %21 = vector.shape_cast %20 : vector<2x8xf32> to vector<2x8x1xf32>
    %22 = vector.broadcast %21 : vector<2x8x1xf32> to vector<2x8x8xf32>
    %23 = arith.subf %19, %22 : vector<2x8x8xf32>
    %24 = math.exp %23 : vector<2x8x8xf32>
    %cst_11 = arith.constant dense<0.000000e+00> : vector<2x8xf32>
    %25 = vector.multi_reduction <add>, %24, %cst_11 [2] : vector<2x8x8xf32> to vector<2x8xf32>
    %26 = vector.shape_cast %25 : vector<2x8xf32> to vector<2x8x1xf32>
    %27 = vector.broadcast %26 : vector<2x8x1xf32> to vector<2x8x8xf32>
    %28 = arith.divf %24, %27 : vector<2x8x8xf32>
    %29 = arith.truncf %28 : vector<2x8x8xf32> to vector<2x8x8xbf16>
    %cst_12 = arith.constant dense<0.000000e+00> : vector<2x8x8xf32>
    %30 = tpu.matmul %29, %16, %cst_12 {dimension_numbers = #tpu.dot_dimension_numbers<[2], [1], [1], [2], [0, 0, 0, 1, 1, 2], [0], [0]>} : vector<2x8x8xbf16>, vector<2x8x8xbf16>, vector<2x8x8xf32> -> vector<2x8x8xf32>
    %31 = vector.shape_cast %30 : vector<2x8x8xf32> to vector<16x8xf32>
    %32 = arith.truncf %31 : vector<16x8xf32> to vector<16x8xbf16>
    %c0_13 = arith.constant 0 : index
    %c0_14 = arith.constant 0 : index
    %c0_15 = arith.constant 0 : index
    %c0_16 = arith.constant 0 : index
    %33 = vector.load %arg3[%c0_13, %c0_14, %c0_15, %c0_16] : memref<1x4x8x32xbf16, #tpu.memory_space<vmem>>, vector<1x1x8x32xbf16>
    %34 = vector.shape_cast %33 : vector<1x1x8x32xbf16> to vector<8x32xbf16>
    %cst_17 = arith.constant dense<0.000000e+00> : vector<16x32xf32>
    %35 = tpu.matmul %32, %34, %cst_17 {dimension_numbers = #tpu.dot_dimension_numbers<[1], [0], [0], [1], [0, 0, 1, 1], [], []>} : vector<16x8xbf16>, vector<8x32xbf16>, vector<16x32xf32> -> vector<16x32xf32>
    %36 = arith.addf %13, %35 : vector<16x32xf32>
    %37 = vector.extract_strided_slice %9 {offsets = [0, 0, 8], sizes = [2, 8, 8], strides = [1, 1, 1]} : vector<2x8x96xbf16> to vector<2x8x8xbf16>
    %38 = vector.extract_strided_slice %9 {offsets = [0, 0, 40], sizes = [2, 8, 8], strides = [1, 1, 1]} : vector<2x8x96xbf16> to vector<2x8x8xbf16>
    %39 = vector.extract_strided_slice %9 {offsets = [0, 0, 72], sizes = [2, 8, 8], strides = [1, 1, 1]} : vector<2x8x96xbf16> to vector<2x8x8xbf16>
    %cst_18 = arith.constant dense<0.000000e+00> : vector<2x8x8xf32>
    %40 = tpu.matmul %37, %38, %cst_18 {dimension_numbers = #tpu.dot_dimension_numbers<[2], [2], [1], [1], [0, 0, 0, 1, 1, 1], [0], [0]>} : vector<2x8x8xbf16>, vector<2x8x8xbf16>, vector<2x8x8xf32> -> vector<2x8x8xf32>
    %cst_19 = arith.constant 0.353553385 : f32
    %41 = vector.broadcast %cst_19 : f32 to vector<2x8x8xf32>
    %42 = arith.mulf %40, %41 : vector<2x8x8xf32>
    %cst_20 = arith.constant dense<0xFF800000> : vector<2x8xf32>
    %43 = vector.multi_reduction <maximumf>, %42, %cst_20 [2] : vector<2x8x8xf32> to vector<2x8xf32>
    %44 = vector.shape_cast %43 : vector<2x8xf32> to vector<2x8x1xf32>
    %45 = vector.broadcast %44 : vector<2x8x1xf32> to vector<2x8x8xf32>
    %46 = arith.subf %42, %45 : vector<2x8x8xf32>
    %47 = math.exp %46 : vector<2x8x8xf32>
    %cst_21 = arith.constant dense<0.000000e+00> : vector<2x8xf32>
    %48 = vector.multi_reduction <add>, %47, %cst_21 [2] : vector<2x8x8xf32> to vector<2x8xf32>
    %49 = vector.shape_cast %48 : vector<2x8xf32> to vector<2x8x1xf32>
    %50 = vector.broadcast %49 : vector<2x8x1xf32> to vector<2x8x8xf32>
    %51 = arith.divf %47, %50 : vector<2x8x8xf32>
    %52 = arith.truncf %51 : vector<2x8x8xf32> to vector<2x8x8xbf16>
    %cst_22 = arith.constant dense<0.000000e+00> : vector<2x8x8xf32>
    %53 = tpu.matmul %52, %39, %cst_22 {dimension_numbers = #tpu.dot_dimension_numbers<[2], [1], [1], [2], [0, 0, 0, 1, 1, 2], [0], [0]>} : vector<2x8x8xbf16>, vector<2x8x8xbf16>, vector<2x8x8xf32> -> vector<2x8x8xf32>
    %54 = vector.shape_cast %53 : vector<2x8x8xf32> to vector<16x8xf32>
    %55 = arith.truncf %54 : vector<16x8xf32> to vector<16x8xbf16>
    %c0_23 = arith.constant 0 : index
    %c1 = arith.constant 1 : index
    %c0_24 = arith.constant 0 : index
    %c0_25 = arith.constant 0 : index
    %56 = vector.load %arg3[%c0_23, %c1, %c0_24, %c0_25] : memref<1x4x8x32xbf16, #tpu.memory_space<vmem>>, vector<1x1x8x32xbf16>
    %57 = vector.shape_cast %56 : vector<1x1x8x32xbf16> to vector<8x32xbf16>
    %cst_26 = arith.constant dense<0.000000e+00> : vector<16x32xf32>
    %58 = tpu.matmul %55, %57, %cst_26 {dimension_numbers = #tpu.dot_dimension_numbers<[1], [0], [0], [1], [0, 0, 1, 1], [], []>} : vector<16x8xbf16>, vector<8x32xbf16>, vector<16x32xf32> -> vector<16x32xf32>
    %59 = arith.addf %36, %58 : vector<16x32xf32>
    %60 = vector.extract_strided_slice %9 {offsets = [0, 0, 16], sizes = [2, 8, 8], strides = [1, 1, 1]} : vector<2x8x96xbf16> to vector<2x8x8xbf16>
    %61 = vector.extract_strided_slice %9 {offsets = [0, 0, 48], sizes = [2, 8, 8], strides = [1, 1, 1]} : vector<2x8x96xbf16> to vector<2x8x8xbf16>
    %62 = vector.extract_strided_slice %9 {offsets = [0, 0, 80], sizes = [2, 8, 8], strides = [1, 1, 1]} : vector<2x8x96xbf16> to vector<2x8x8xbf16>
    %cst_27 = arith.constant dense<0.000000e+00> : vector<2x8x8xf32>
    %63 = tpu.matmul %60, %61, %cst_27 {dimension_numbers = #tpu.dot_dimension_numbers<[2], [2], [1], [1], [0, 0, 0, 1, 1, 1], [0], [0]>} : vector<2x8x8xbf16>, vector<2x8x8xbf16>, vector<2x8x8xf32> -> vector<2x8x8xf32>
    %cst_28 = arith.constant 0.353553385 : f32
    %64 = vector.broadcast %cst_28 : f32 to vector<2x8x8xf32>
    %65 = arith.mulf %63, %64 : vector<2x8x8xf32>
    %cst_29 = arith.constant dense<0xFF800000> : vector<2x8xf32>
    %66 = vector.multi_reduction <maximumf>, %65, %cst_29 [2] : vector<2x8x8xf32> to vector<2x8xf32>
    %67 = vector.shape_cast %66 : vector<2x8xf32> to vector<2x8x1xf32>
    %68 = vector.broadcast %67 : vector<2x8x1xf32> to vector<2x8x8xf32>
    %69 = arith.subf %65, %68 : vector<2x8x8xf32>
    %70 = math.exp %69 : vector<2x8x8xf32>
    %cst_30 = arith.constant dense<0.000000e+00> : vector<2x8xf32>
    %71 = vector.multi_reduction <add>, %70, %cst_30 [2] : vector<2x8x8xf32> to vector<2x8xf32>
    %72 = vector.shape_cast %71 : vector<2x8xf32> to vector<2x8x1xf32>
    %73 = vector.broadcast %72 : vector<2x8x1xf32> to vector<2x8x8xf32>
    %74 = arith.divf %70, %73 : vector<2x8x8xf32>
    %75 = arith.truncf %74 : vector<2x8x8xf32> to vector<2x8x8xbf16>
    %cst_31 = arith.constant dense<0.000000e+00> : vector<2x8x8xf32>
    %76 = tpu.matmul %75, %62, %cst_31 {dimension_numbers = #tpu.dot_dimension_numbers<[2], [1], [1], [2], [0, 0, 0, 1, 1, 2], [0], [0]>} : vector<2x8x8xbf16>, vector<2x8x8xbf16>, vector<2x8x8xf32> -> vector<2x8x8xf32>
    %77 = vector.shape_cast %76 : vector<2x8x8xf32> to vector<16x8xf32>
    %78 = arith.truncf %77 : vector<16x8xf32> to vector<16x8xbf16>
    %c0_32 = arith.constant 0 : index
    %c2 = arith.constant 2 : index
    %c0_33 = arith.constant 0 : index
    %c0_34 = arith.constant 0 : index
    %79 = vector.load %arg3[%c0_32, %c2, %c0_33, %c0_34] : memref<1x4x8x32xbf16, #tpu.memory_space<vmem>>, vector<1x1x8x32xbf16>
    %80 = vector.shape_cast %79 : vector<1x1x8x32xbf16> to vector<8x32xbf16>
    %cst_35 = arith.constant dense<0.000000e+00> : vector<16x32xf32>
    %81 = tpu.matmul %78, %80, %cst_35 {dimension_numbers = #tpu.dot_dimension_numbers<[1], [0], [0], [1], [0, 0, 1, 1], [], []>} : vector<16x8xbf16>, vector<8x32xbf16>, vector<16x32xf32> -> vector<16x32xf32>
    %82 = arith.addf %59, %81 : vector<16x32xf32>
    %83 = vector.extract_strided_slice %9 {offsets = [0, 0, 24], sizes = [2, 8, 8], strides = [1, 1, 1]} : vector<2x8x96xbf16> to vector<2x8x8xbf16>
    %84 = vector.extract_strided_slice %9 {offsets = [0, 0, 56], sizes = [2, 8, 8], strides = [1, 1, 1]} : vector<2x8x96xbf16> to vector<2x8x8xbf16>
    %85 = vector.extract_strided_slice %9 {offsets = [0, 0, 88], sizes = [2, 8, 8], strides = [1, 1, 1]} : vector<2x8x96xbf16> to vector<2x8x8xbf16>
    %cst_36 = arith.constant dense<0.000000e+00> : vector<2x8x8xf32>
    %86 = tpu.matmul %83, %84, %cst_36 {dimension_numbers = #tpu.dot_dimension_numbers<[2], [2], [1], [1], [0, 0, 0, 1, 1, 1], [0], [0]>} : vector<2x8x8xbf16>, vector<2x8x8xbf16>, vector<2x8x8xf32> -> vector<2x8x8xf32>
    %cst_37 = arith.constant 0.353553385 : f32
    %87 = vector.broadcast %cst_37 : f32 to vector<2x8x8xf32>
    %88 = arith.mulf %86, %87 : vector<2x8x8xf32>
    %cst_38 = arith.constant dense<0xFF800000> : vector<2x8xf32>
    %89 = vector.multi_reduction <maximumf>, %88, %cst_38 [2] : vector<2x8x8xf32> to vector<2x8xf32>
    %90 = vector.shape_cast %89 : vector<2x8xf32> to vector<2x8x1xf32>
    %91 = vector.broadcast %90 : vector<2x8x1xf32> to vector<2x8x8xf32>
    %92 = arith.subf %88, %91 : vector<2x8x8xf32>
    %93 = math.exp %92 : vector<2x8x8xf32>
    %cst_39 = arith.constant dense<0.000000e+00> : vector<2x8xf32>
    %94 = vector.multi_reduction <add>, %93, %cst_39 [2] : vector<2x8x8xf32> to vector<2x8xf32>
    %95 = vector.shape_cast %94 : vector<2x8xf32> to vector<2x8x1xf32>
    %96 = vector.broadcast %95 : vector<2x8x1xf32> to vector<2x8x8xf32>
    %97 = arith.divf %93, %96 : vector<2x8x8xf32>
    %98 = arith.truncf %97 : vector<2x8x8xf32> to vector<2x8x8xbf16>
    %cst_40 = arith.constant dense<0.000000e+00> : vector<2x8x8xf32>
    %99 = tpu.matmul %98, %85, %cst_40 {dimension_numbers = #tpu.dot_dimension_numbers<[2], [1], [1], [2], [0, 0, 0, 1, 1, 2], [0], [0]>} : vector<2x8x8xbf16>, vector<2x8x8xbf16>, vector<2x8x8xf32> -> vector<2x8x8xf32>
    %100 = vector.shape_cast %99 : vector<2x8x8xf32> to vector<16x8xf32>
    %101 = arith.truncf %100 : vector<16x8xf32> to vector<16x8xbf16>
    %c0_41 = arith.constant 0 : index
    %c3 = arith.constant 3 : index
    %c0_42 = arith.constant 0 : index
    %c0_43 = arith.constant 0 : index
    %102 = vector.load %arg3[%c0_41, %c3, %c0_42, %c0_43] : memref<1x4x8x32xbf16, #tpu.memory_space<vmem>>, vector<1x1x8x32xbf16>
    %103 = vector.shape_cast %102 : vector<1x1x8x32xbf16> to vector<8x32xbf16>
    %cst_44 = arith.constant dense<0.000000e+00> : vector<16x32xf32>
    %104 = tpu.matmul %101, %103, %cst_44 {dimension_numbers = #tpu.dot_dimension_numbers<[1], [0], [0], [1], [0, 0, 1, 1], [], []>} : vector<16x8xbf16>, vector<8x32xbf16>, vector<16x32xf32> -> vector<16x32xf32>
    %105 = arith.addf %82, %104 : vector<16x32xf32>
    %106 = arith.addf %3, %105 : vector<16x32xf32>
    %c0_45 = arith.constant 0 : index
    %c0_46 = arith.constant 0 : index
    %c0_47 = arith.constant 0 : index
    %107 = vector.load %arg5[%c0_45, %c0_46, %c0_47] : memref<1x1x32xf32, #tpu.memory_space<vmem>>, vector<1x1x32xf32>
    %108 = vector.shape_cast %107 : vector<1x1x32xf32> to vector<1x32xf32>
    %c0_48 = arith.constant 0 : index
    %c0_49 = arith.constant 0 : index
    %c0_50 = arith.constant 0 : index
    %109 = vector.load %arg6[%c0_48, %c0_49, %c0_50] : memref<1x1x32xf32, #tpu.memory_space<vmem>>, vector<1x1x32xf32>
    %110 = vector.shape_cast %109 : vector<1x1x32xf32> to vector<1x32xf32>
    %cst_51 = arith.constant dense<0.000000e+00> : vector<16xf32>
    %111 = vector.multi_reduction <add>, %106, %cst_51 [1] : vector<16x32xf32> to vector<16xf32>
    %112 = vector.shape_cast %111 : vector<16xf32> to vector<16x1xf32>
    %cst_52 = arith.constant 3.200000e+01 : f32
    %113 = vector.broadcast %cst_52 : f32 to vector<16x1xf32>
    %114 = arith.divf %112, %113 : vector<16x1xf32>
    %115 = vector.broadcast %114 : vector<16x1xf32> to vector<16x32xf32>
    %116 = arith.subf %106, %115 : vector<16x32xf32>
    %117 = arith.mulf %116, %116 : vector<16x32xf32>
    %cst_53 = arith.constant dense<0.000000e+00> : vector<16xf32>
    %118 = vector.multi_reduction <add>, %117, %cst_53 [1] : vector<16x32xf32> to vector<16xf32>
    %119 = vector.shape_cast %118 : vector<16xf32> to vector<16x1xf32>
    %cst_54 = arith.constant 3.200000e+01 : f32
    %120 = vector.broadcast %cst_54 : f32 to vector<16x1xf32>
    %121 = arith.divf %119, %120 : vector<16x1xf32>
    %122 = vector.broadcast %114 : vector<16x1xf32> to vector<16x32xf32>
    %123 = arith.subf %106, %122 : vector<16x32xf32>
    %cst_55 = arith.constant 9.99999974E-6 : f32
    %124 = vector.broadcast %cst_55 : f32 to vector<16x1xf32>
    %125 = arith.addf %121, %124 : vector<16x1xf32>
    %126 = math.rsqrt %125 : vector<16x1xf32>
    %127 = vector.broadcast %126 : vector<16x1xf32> to vector<16x32xf32>
    %128 = arith.mulf %123, %127 : vector<16x32xf32>
    %129 = vector.broadcast %108 : vector<1x32xf32> to vector<16x32xf32>
    %130 = arith.mulf %128, %129 : vector<16x32xf32>
    %131 = vector.broadcast %110 : vector<1x32xf32> to vector<16x32xf32>
    %132 = arith.addf %130, %131 : vector<16x32xf32>
    %133 = arith.truncf %132 : vector<16x32xf32> to vector<16x32xbf16>
    %c0_56 = arith.constant 0 : index
    %c0_57 = arith.constant 0 : index
    %c0_58 = arith.constant 0 : index
    %134 = vector.load %arg7[%c0_56, %c0_57, %c0_58] : memref<1x32x64xbf16, #tpu.memory_space<vmem>>, vector<1x32x64xbf16>
    %135 = vector.shape_cast %134 : vector<1x32x64xbf16> to vector<32x64xbf16>
    %cst_59 = arith.constant dense<0.000000e+00> : vector<16x64xf32>
    %136 = tpu.matmul %133, %135, %cst_59 {dimension_numbers = #tpu.dot_dimension_numbers<[1], [0], [0], [1], [0, 0, 1, 1], [], []>} : vector<16x32xbf16>, vector<32x64xbf16>, vector<16x64xf32> -> vector<16x64xf32>
    %c0_60 = arith.constant 0 : index
    %c0_61 = arith.constant 0 : index
    %c0_62 = arith.constant 0 : index
    %137 = vector.load %arg8[%c0_60, %c0_61, %c0_62] : memref<1x1x64xf32, #tpu.memory_space<vmem>>, vector<1x1x64xf32>
    %138 = vector.shape_cast %137 : vector<1x1x64xf32> to vector<1x64xf32>
    %139 = vector.broadcast %138 : vector<1x64xf32> to vector<16x64xf32>
    %140 = arith.addf %136, %139 : vector<16x64xf32>
    %cst_63 = arith.constant 0.000000e+00 : f32
    %141 = vector.broadcast %cst_63 : f32 to vector<16x64xf32>
    %142 = arith.maximumf %140, %141 : vector<16x64xf32>
    %143 = arith.truncf %142 : vector<16x64xf32> to vector<16x64xbf16>
    %c0_64 = arith.constant 0 : index
    %c0_65 = arith.constant 0 : index
    %c0_66 = arith.constant 0 : index
    %144 = vector.load %arg9[%c0_64, %c0_65, %c0_66] : memref<1x64x32xbf16, #tpu.memory_space<vmem>>, vector<1x64x32xbf16>
    %145 = vector.shape_cast %144 : vector<1x64x32xbf16> to vector<64x32xbf16>
    %cst_67 = arith.constant dense<0.000000e+00> : vector<16x32xf32>
    %146 = tpu.matmul %143, %145, %cst_67 {dimension_numbers = #tpu.dot_dimension_numbers<[1], [0], [0], [1], [0, 0, 1, 1], [], []>} : vector<16x64xbf16>, vector<64x32xbf16>, vector<16x32xf32> -> vector<16x32xf32>
    %c0_68 = arith.constant 0 : index
    %c0_69 = arith.constant 0 : index
    %c0_70 = arith.constant 0 : index
    %147 = vector.load %arg10[%c0_68, %c0_69, %c0_70] : memref<1x1x32xf32, #tpu.memory_space<vmem>>, vector<1x1x32xf32>
    %148 = vector.shape_cast %147 : vector<1x1x32xf32> to vector<1x32xf32>
    %149 = vector.broadcast %148 : vector<1x32xf32> to vector<16x32xf32>
    %150 = arith.addf %146, %149 : vector<16x32xf32>
    %151 = arith.addf %132, %150 : vector<16x32xf32>
    %c0_71 = arith.constant 0 : index
    %c0_72 = arith.constant 0 : index
    %c0_73 = arith.constant 0 : index
    %152 = vector.load %arg11[%c0_71, %c0_72, %c0_73] : memref<1x1x32xf32, #tpu.memory_space<vmem>>, vector<1x1x32xf32>
    %153 = vector.shape_cast %152 : vector<1x1x32xf32> to vector<1x32xf32>
    %c0_74 = arith.constant 0 : index
    %c0_75 = arith.constant 0 : index
    %c0_76 = arith.constant 0 : index
    %154 = vector.load %arg12[%c0_74, %c0_75, %c0_76] : memref<1x1x32xf32, #tpu.memory_space<vmem>>, vector<1x1x32xf32>
    %155 = vector.shape_cast %154 : vector<1x1x32xf32> to vector<1x32xf32>
    %cst_77 = arith.constant dense<0.000000e+00> : vector<16xf32>
    %156 = vector.multi_reduction <add>, %151, %cst_77 [1] : vector<16x32xf32> to vector<16xf32>
    %157 = vector.shape_cast %156 : vector<16xf32> to vector<16x1xf32>
    %cst_78 = arith.constant 3.200000e+01 : f32
    %158 = vector.broadcast %cst_78 : f32 to vector<16x1xf32>
    %159 = arith.divf %157, %158 : vector<16x1xf32>
    %160 = vector.broadcast %159 : vector<16x1xf32> to vector<16x32xf32>
    %161 = arith.subf %151, %160 : vector<16x32xf32>
    %162 = arith.mulf %161, %161 : vector<16x32xf32>
    %cst_79 = arith.constant dense<0.000000e+00> : vector<16xf32>
    %163 = vector.multi_reduction <add>, %162, %cst_79 [1] : vector<16x32xf32> to vector<16xf32>
    %164 = vector.shape_cast %163 : vector<16xf32> to vector<16x1xf32>
    %cst_80 = arith.constant 3.200000e+01 : f32
    %165 = vector.broadcast %cst_80 : f32 to vector<16x1xf32>
    %166 = arith.divf %164, %165 : vector<16x1xf32>
    %167 = vector.broadcast %159 : vector<16x1xf32> to vector<16x32xf32>
    %168 = arith.subf %151, %167 : vector<16x32xf32>
    %cst_81 = arith.constant 9.99999974E-6 : f32
    %169 = vector.broadcast %cst_81 : f32 to vector<16x1xf32>
    %170 = arith.addf %166, %169 : vector<16x1xf32>
    %171 = math.rsqrt %170 : vector<16x1xf32>
    %172 = vector.broadcast %171 : vector<16x1xf32> to vector<16x32xf32>
    %173 = arith.mulf %168, %172 : vector<16x32xf32>
    %174 = vector.broadcast %153 : vector<1x32xf32> to vector<16x32xf32>
    %175 = arith.mulf %173, %174 : vector<16x32xf32>
    %176 = vector.broadcast %155 : vector<1x32xf32> to vector<16x32xf32>
    %177 = arith.addf %175, %176 : vector<16x32xf32>
    %c0_82 = arith.constant 0 : index
    %c0_83 = arith.constant 0 : index
    %178 = vector.load %arg13[%c0_82, %c0_83] : memref<16x32xf32, #tpu.memory_space<vmem>>, vector<16x32xf32>
    tpu.vector_store %arg13[%c0_82, %c0_83], %177 {strides = array<i32>} : memref<16x32xf32, #tpu.memory_space<vmem>>, vector<16x32xf32>,
    return
  }
  func.func @transform_1(%arg0: i32) -> (i32, i32, i32) {
    %c0_i32 = arith.constant 0 : i32
    %c0_i32_0 = arith.constant 0 : i32
    %c0_i32_1 = arith.constant 0 : i32
    return %arg0, %c0_i32, %c0_i32_0 : i32, i32, i32
  }
  func.func @transform_2(%arg0: i32) -> (i32, i32, i32, i32) {
    %c0_i32 = arith.constant 0 : i32
    %c0_i32_0 = arith.constant 0 : i32
    %c0_i32_1 = arith.constant 0 : i32
    %c0_i32_2 = arith.constant 0 : i32
    return %arg0, %c0_i32, %c0_i32_0, %c0_i32_1 : i32, i32, i32, i32
  }
  func.func @transform_3(%arg0: i32) -> (i32, i32, i32) {
    %c0_i32 = arith.constant 0 : i32
    %c0_i32_0 = arith.constant 0 : i32
    %c0_i32_1 = arith.constant 0 : i32
    return %arg0, %c0_i32, %c0_i32_0 : i32, i32, i32
  }
  func.func @transform_4(%arg0: i32) -> (i32, i32, i32) {
    %c0_i32 = arith.constant 0 : i32
    %c0_i32_0 = arith.constant 0 : i32
    %c0_i32_1 = arith.constant 0 : i32
    return %arg0, %c0_i32, %c0_i32_0 : i32, i32, i32
  }
  func.func @transform_5(%arg0: i32) -> (i32, i32, i32) {
    %c0_i32 = arith.constant 0 : i32
    %c0_i32_0 = arith.constant 0 : i32
    %c0_i32_1 = arith.constant 0 : i32
    return %arg0, %c0_i32, %c0_i32_0 : i32, i32, i32
  }
  func.func @transform_6(%arg0: i32) -> (i32, i32, i32) {
    %c0_i32 = arith.constant 0 : i32
    %c0_i32_0 = arith.constant 0 : i32
    %c0_i32_1 = arith.constant 0 : i32
    return %arg0, %c0_i32, %c0_i32_0 : i32, i32, i32
  }
  func.func @transform_7(%arg0: i32) -> (i32, i32, i32) {
    %c0_i32 = arith.constant 0 : i32
    %c0_i32_0 = arith.constant 0 : i32
    %c0_i32_1 = arith.constant 0 : i32
    return %arg0, %c0_i32, %c0_i32_0 : i32, i32, i32
  }
  func.func @transform_8(%arg0: i32) -> (i32, i32, i32) {
    %c0_i32 = arith.constant 0 : i32
    %c0_i32_0 = arith.constant 0 : i32
    %c0_i32_1 = arith.constant 0 : i32
    return %arg0, %c0_i32, %c0_i32_0 : i32, i32, i32
  }
  func.func @transform_9(%arg0: i32) -> (i32, i32, i32) {
    %c0_i32 = arith.constant 0 : i32
    %c0_i32_0 = arith.constant 0 : i32
    %c0_i32_1 = arith.constant 0 : i32
    return %arg0, %c0_i32, %c0_i32_0 : i32, i32, i32
  }
  func.func @transform_10(%arg0: i32) -> (i32, i32, i32) {
    %c0_i32 = arith.constant 0 : i32
    %c0_i32_0 = arith.constant 0 : i32
    %c0_i32_1 = arith.constant 0 : i32
    return %arg0, %c0_i32, %c0_i32_0 : i32, i32, i32
  }
  func.func @transform_11(%arg0: i32) -> (i32, i32, i32) {
    %c0_i32 = arith.constant 0 : i32
    %c0_i32_0 = arith.constant 0 : i32
    %c0_i32_1 = arith.constant 0 : i32
    return %arg0, %c0_i32, %c0_i32_0 : i32, i32, i32
  }
  func.func @transform_12(%arg0: i32) -> (i32, i32) {
    %c0_i32 = arith.constant 0 : i32
    %c0_i32_0 = arith.constant 0 : i32
    %c0_i32_1 = arith.constant 0 : i32
    return %c0_i32, %c0_i32_0 : i32, i32
  }
}

</mosaic_0001>

<bundles_post_ra>
// kernel: tpu_custom_call.1
= control target key start
LH: loop header
LB: loop body
LE: loop exit
PB: predicated region body
PF: predicated region fallthrough
CT: control target
= control target key end

     0   :  { %s2992_s0 = inlined_call_operand.hbm [shape: f32[16,32], index: 0, kind: input, shape index: {}]   ;;  %s2993_s1 = inlined_call_operand.vmem [shape: bf16[2,32,96], index: 1, kind: input, shape index: {}]   ;;  %s2994_s2 = inlined_call_operand.vmem [shape: bf16[2,4,8,32], index: 2, kind: input, shape index: {}]   ;;  %s2995_s3 = inlined_call_operand.vmem [shape: f32[2,1,32], index: 3, kind: input, shape index: {}]   ;;  %s2996_s4 = inlined_call_operand.vmem [shape: f32[2,1,32], index: 4, kind: input, shape index: {}]   ;;  %s2997_s5 = inlined_call_operand.vmem [shape: f32[2,1,32], index: 5, kind: input, shape index: {}]   ;;  %s2998_s6 = inlined_call_operand.vmem [shape: bf16[2,32,64], index: 6, kind: input, shape index: {}]   ;;  %s2999_s7 = inlined_call_operand.vmem [shape: f32[2,1,64], index: 7, kind: input, shape index: {}]   ;;  %s3000_s8 = inlined_call_operand.vmem [shape: bf16[2,64,32], index: 8, kind: input, shape index: {}]   ;;  %s3001_s9 = inlined_call_operand.vmem [shape: f32[2,1,32], index: 9, kind: input, shape index: {}]   ;;  %s3002_s10 = inlined_call_operand.vmem [shape: f32[2,1,32], index: 10, kind: input, shape index: {}]   ;;  %s3003_s11 = inlined_call_operand.vmem [shape: f32[2,1,32], index: 11, kind: input, shape index: {}]   ;;  %s3004_s12 = inlined_call_operand.hbm [shape: f32[16,32], index: 12, kind: output, shape index: {}]  }
   0x1   :  { %3007 = sst [smem:[#allocation12_spill]] %s2993_s1 }
   0x2   :  { %3008 = sst [smem:[#allocation13_spill]] %s2994_s2 }
   0x3   :  { %3009 = sst [smem:[#allocation14_spill]] %s2995_s3 }
   0x4   :  { %3010 = sst [smem:[#allocation15_spill]] %s3004_s12 }
   0x5   :  { %17 = vsyncpa [#allocation4], 0  ;;  %s2615_s21 = smov 0  }
   0x6 LB: > { %3011 = sst [smem:[#allocation11_spill]] %s2532_s21  ;;  %s2621_s22 = sadd.s32 4294967295, %s2532_s21   ;;  %s2532_s21 = sphi %s2615_s21, %s23_s21  }
   0x7   : > { %p2125_p0 = scmp.ge.s32.totalorder %s2532_s21, 1  ;;  %p420_p1 = scmp.lt.s32.totalorder %s2532_s21, 3 }
   0x9   : > { %p421_p2 = pnand %p2125_p0, %p420_p1 }
   0xa   : > { %p491_p3 = scmp.lt.s32.totalorder (!%p421_p2), %s2621_s22, 1  ;;  %p2391_p4 = scmp.eq.s32.totalorder (!%p421_p2), %s2621_s22, 0 }
   0xb   : > { %424 = sbr.rel (%p421_p2) target bundleno = 4703 (0x125f), region = 64  ;;  %s2534_s24 = smov (!%p421_p2), [#allocation3]  }
   0xc   : > { %s544_s25 = sshll.u32 (!%p421_p2), %s2534_s24, 4  ;;  %s3013_s1 = sld [smem:[#allocation12_spill]] (!%p421_p2)  ;;  %s2680_s25 = int_to_ptr.vmem [resolvable:$true] %s544_s25 }
   0xd   : > { %s3014_s2 = sld [smem:[#allocation13_spill]] (!%p421_p2) }
  0x12   : > { %s2627_s23 = scalar_select %p491_p3, %s2621_s22, 1 }
  0x14   : > { %s2181_s26 = sshll.u32 %s2627_s23, 4  ;;  %s2184_s15 = sshll.u32 %s2627_s23, 5 }
  0x15   : > { %s2638_s14 = scalar_lea.vmem %s3013_s1, %s2181_s26  ;;  %s2643_s17 = scalar_lea.vmem %s3014_s2, %s2181_s26 }
  0x16   : > { %s2656_s12 = scalar_lea.vmem %s2998_s6, %s2181_s26  ;;  %s517_s1 = scalar_lea.vmem %s2999_s7, %s2627_s23 }
  0x17   : > { %s2670_s20 = scalar_lea.vmem %s3000_s8, %s2184_s15  ;;  %s528_s29 = scalar_lea.vmem %s3002_s10, %s2627_s23 }
  0x18   : > { %s531_s27 = scalar_lea.vmem %s3003_s11, %s2627_s23  ;;  %s2466_s2 = scalar_lea.hbm %s2992_s0, 256 }
  0x19   : > { %p2467_p5 = scmp.ne.s32.totalorder %s2992_s0, %s2466_s2  ;;  %p2472_p8 = scmp.lt.u32.totalorder %s2466_s2, %s2992_s0 }
  0x1b   : > { %p2468_p6 = pnand %p2467_p5, %p2391_p4 }
  0x1d   : > { %p2469_p7 = pneg %p2468_p6 }
  0x1f   : > { %p2474_p9 = pnand %p2472_p8, %p2469_p7 }
  0x21   : > { %2477 = shalt.err (!%p2474_p9)  }
  0x22   : > { %s2694_s19 = scalar_lea.vmem %s2680_s25, 256  ;;  %p2485_p13 = scmp.lt.s32.totalorder %s2680_s25, %s2680_s25 }
  0x23   : > { %p2479_p10 = scmp.ne.s32.totalorder %s2680_s25, %s2694_s19  ;;  %p2486_p0 = scmp.lt.s32.totalorder %s2694_s19, %s2694_s19 }
  0x25   : > { %p2480_p11 = pnand %p2479_p10, %p2391_p4  ;;  %p2707_p1 = por %p2486_p0, %p2485_p13 }
  0x27   : > { %p2481_p12 = pneg %p2480_p11 }
  0x29   : > { %p2488_p2 = pnand %p2707_p1, %p2481_p12 }
  0x2b   : > { %2491 = shalt.err (!%p2488_p2)  }
  0x2c   : > { %2385 = dma.hbm_to_vmem [thread:$0]  (%p2391_p4), %s2992_s0, 256, %s2680_s25, [#allocation2] }
  0x2d   : > { %2523 = dma.done.wait (%p2391_p4), [#allocation2], 256 }
  0x2e   : > { %2525 = vsyncadd (%p2391_p4), [#allocation2], 4294967040  ;;  %v2535_v0 = vmov 0.0   ;;  %vm2536_vm0 = vmmov 0   ;;  %v2418_v1 = vld [vmem:[%s2638_s14] sm:$0xff]   ;;  %v2419_v2 = vld [vmem:[%s2638_s14 + $0x8] sm:$0xff]   ;;  %s3019_s15 = scalar_lea.vmem %s2997_s5, %s2627_s23 }
  0x2f   : > { %2236 = vmatprep.subr.bf16.mxu1 %v2535_v0  ;;  %2240 = vmatprep.mubr.msk.bf16.mxu1 %vm2536_vm0, %v2535_v0  ;;  %v2731_v3 = vld [vmem:[#allocation3] sm:$0xff]  ;;  %v2733_v4 = vld [vmem:[#allocation3 + $0x8] sm:$0xff]  ;;  %vm570_vm1 = vcmask 261120   ;;  %s2537_s14 = smov 96   ;;  %vm627_vm2 = vcmask 64512   ;;  %s2538_s26 = smov 64  }
  0x30   : > { %2250 = vmatprep.subr.bf16.mxu0 %v2535_v0  ;;  %2252 = vmatprep.mubr.msk.bf16.mxu0 %vm2536_vm0, %v2535_v0  ;;  %v553_v5 = vpack.c.bf16 %v2733_v4, %v2731_v3  ;;  %vm754_vm3 = vcmask 1043456   ;;  %s2539_s28 = smov 120   ;;  %s2540_s30 = smov 88   ;;  %v847_v45 = vld [vmem:[%s2643_s17] sm:$0xf]  ;;  %vm1876_vm4 = vcmask 523264  }
  0x31   : > { %2237 = vmatpush3.bf16.msra.mxu1 %v2418_v1  ;;  %v852_v48 = vsel %vm754_vm3, %v847_v45, 0  ;;  %s2541_s13 = smov 56   ;;  %s2542_s2 = smov 112  }
  0x32   : > { %2238 = vmatprep.subr.bf16.mxu1 %v2535_v0  ;;  %s2543_s16 = smov 80   ;;  %s3016_s21 = sld [smem:[#allocation14_spill]] }
  0x33   : > { %p2392_p3 = scmp.eq.s32.totalorder %s2621_s22, 1 }
  0x35   : > { %2239 = vmatpush3.bf16.msra.mxu1 %v2419_v2  ;;  %p2494_p4 = pnand %p2479_p10, %p2392_p3 }
  0x36   : > { %2244 = vmatprep.subr.bf16.mxu1 %v2535_v0 }
  0x37   : > { %p2495_p5 = pneg %p2494_p4 }
  0x38   : > { %2241 = vmatmul.mubr.msk.bf16.vlgmr.msra.gmra.mrb[0].mxu1 %vm570_vm1, %v553_v5  ;;  %s3017_s24 = scalar_lea.vmem %s3016_s21, %s2627_s23 }
  0x39   : > { %2246 = vmatprep.mubr.msk.bf16.mxu1 %vm2536_vm0, %v2535_v0  ;;  %p2502_p6 = pnand %p2495_p5, %p2707_p1 }
 0x10b   : > { %v608_v6 = vpop.f32.mrb[0].mxu1 }
 0x10c   : > { %v2742_v7 = vpack.c.bf16 %v608_v6, %v608_v6  ;;  %v2242_v8 = vpop.f32.mrb[1].mxu1 }
 0x10d   : > { %v611_v9 = vpop.f32.mrb[2].mxu1 }
 0x10e   : > { %625 = vrot.lane.b32.xlu0 %v2742_v7, %s2537_s14  ;;  %v2243_v10 = vpop.f32.mrb[3].mxu1  ;;  %v2745_v11 = vpack.c.bf16 %v611_v9, %v611_v9 }
 0x112   : > { %675 = vrot.lane.b32.xlu0 %v2745_v11, %s2537_s14  ;;  %s2544_s14 = smov 48  }
 0x180   : > { %v626_v12 = vpop.permute.xlu0 %625 }
 0x181   : > { %v632_v13 = vsel %vm627_vm2, %v626_v12, 0 }
 0x182   : > { %2245 = vmatpush3.bf16.xpose.msra.mxu1 %v632_v13 }
 0x183   : > { %2256 = vmatprep.subr.bf16.mxu1 %v2535_v0 }
 0x184   : > { %v676_v14 = vpop.permute.xlu0 %675 }
 0x185   : > { %v681_v15 = vsel %vm627_vm2, %v676_v14, 0 }
 0x186   : > { %2251 = vmatpush3.bf16.xpose.msra.mxu0 %v681_v15 }
 0x187   : > { %2262 = vmatprep.subr.bf16.mxu0 %v2535_v0 }
 0x189   : > { %2247 = vmatmul.mubr.msk.bf16.vlgmr.msra.gmra.mrb[4].mxu1 %vm627_vm2, %v2742_v7 }
 0x18a   : > { %2258 = vmatprep.mubr.msk.bf16.mxu1 %vm2536_vm0, %v2535_v0 }
 0x18d   : > { %2253 = vmatmul.mubr.msk.bf16.vlgmr.msra.gmra.mrb[0].mxu0 %vm627_vm2, %v2745_v11 }
 0x18e   : > { %2264 = vmatprep.mubr.msk.bf16.mxu0 %vm2536_vm0, %v2535_v0 }
 0x25c   : > { %v668_v16 = vpop.f32.mrb[4].mxu1 }
 0x25d   : > { %v723_v17 = vmul.f32 0.35355338, %v668_v16  ;;  %v2248_v18 = vpop.f32.mrb[5].mxu1 }
 0x25e   : > { %v671_v19 = vpop.f32.mrb[6].mxu1 }
 0x25f   : > { %v2249_v20 = vpop.f32.mrb[7].mxu1  ;;  %v725_v21 = vsel %vm627_vm2, %v723_v17, -inf }
 0x260   : > { %v717_v22 = vpop.f32.mrb[0].mxu0  ;;  %726 = vmax.xlane.f32.xlu1 %v725_v21 }
 0x261   : > { %v724_v23 = vmul.f32 0.35355338, %v717_v22  ;;  %v2254_v24 = vpop.f32.mrb[1].mxu0 }
 0x262   : > { %v720_v25 = vpop.f32.mrb[2].mxu0 }
 0x263   : > { %v2255_v26 = vpop.f32.mrb[3].mxu0  ;;  %v728_v27 = vsel %vm627_vm2, %v724_v23, -inf }
 0x264   : > { %729 = vmax.xlane.f32.xlu1 %v728_v27 }
 0x275   : > { %749 = vrot.lane.b32.xlu1 %v2742_v7, %s2538_s26 }
 0x2ed   : > { %v727_v28 = vpop.xlane.xlu1 %726 }
 0x2ee   : > { %v731_v29 = vsub.f32 %v723_v17, %v727_v28 }
 0x2f0   : > { %v733_v30 = vmul.f32 1.442695, %v731_v29 }
 0x2f1   : > { %v730_v31 = vpop.xlane.xlu1 %729 }
 0x2f2   : > { %2426 = vpow2.f32 %v733_v30  ;;  %v732_v32 = vsub.f32 %v724_v23, %v730_v31 }
 0x2f4   : > { %v735_v33 = vmul.f32 1.442695, %v732_v32 }
 0x2f5   : > { %v750_v34 = vpop.permute.xlu1 %749 }
 0x2f6   : > { %2428 = vpow2.f32 %v735_v33  ;;  %v756_v35 = vsel %vm754_vm3, %v750_v34, 0 }
 0x2f7   : > { %2257 = vmatpush3.bf16.msra.mxu1 %v756_v35 }
 0x2f8   : > { %2268 = vmatprep.subr.bf16.mxu1 %v2535_v0 }
 0x2fc   : > { %v2427_v36 = vpop.eup %2426 }
 0x2fd   : > { %v737_v37 = vsel %vm627_vm2, %v2427_v36, 0.0 }
 0x2fe   : > { %738 = vadd.xlane.f32.xlu0 %v737_v37 }
 0x300   : > { %v2429_v38 = vpop.eup %2428 }
 0x301   : > { %v740_v39 = vsel %vm627_vm2, %v2429_v38, 0.0 }
 0x302   : > { %741 = vadd.xlane.f32.xlu1 %v740_v39 }
 0x313   : > { %798 = vrot.lane.b32.xlu1 %v2745_v11, %s2538_s26  ;;  %s2545_s26 = smov 72  }
 0x314   : > { %897 = vrot.lane.b32.xlu0 %v2742_v7, %s2539_s28 }
 0x317   : > { %899 = vrot.lane.b32.xlu1 %v2742_v7, %s2540_s30 }
 0x31b   : > { %949 = vrot.lane.b32.xlu1 %v2745_v11, %s2540_s30  ;;  %s2547_s30 = smov 40  }
 0x31f   : > { %947 = vrot.lane.b32.xlu1 %v2745_v11, %s2539_s28  ;;  %s2546_s28 = smov 104  }
 0x38b   : > { %v739_v40 = vpop.xlane.xlu0 %738 }
 0x38c   : > { %2430 = vrcp.f32 %v739_v40 }
 0x38f   : > { %v742_v41 = vpop.xlane.xlu1 %741  ;;  %v898_v54 = vpop.permute.xlu0 %897 }
 0x390   : > { %2432 = vrcp.f32 %v742_v41 }
 0x393   : > { %v799_v42 = vpop.permute.xlu1 %798 }
 0x394   : > { %v804_v43 = vsel %vm754_vm3, %v799_v42, 0 }
 0x395   : > { %2263 = vmatpush3.bf16.msra.mxu0 %v804_v43 }
 0x396   : > { %v2431_v44 = vpop.eup %2430  ;;  %2274 = vmatprep.subr.bf16.mxu0 %v2535_v0 }
 0x397   : > { %v744_v46 = vmul.f32 %v2431_v44, %v2427_v36  ;;  %v900_v51 = vpop.permute.xlu1 %899 }
 0x398   : > { %v905_v53 = vsel %vm627_vm2, %v900_v51, 0 }
 0x399   : > { %v747_v47 = vpack.c.bf16 %v744_v46, %v744_v46 }
 0x39a   : > { %v2433_v49 = vpop.eup %2432 }
 0x39b   : > { %v746_v50 = vmul.f32 %v2433_v49, %v2429_v38  ;;  %2259 = vmatmul.mubr.msk.bf16.vlgmr.msra.gmra.mrb[8].mxu1 %vm627_vm2, %v747_v47  ;;  %v950_v59 = vpop.permute.xlu1 %949  ;;  %v2148_v49 = vld [vmem:[%s2643_s17 + $0x4] sm:$0xf] }
 0x39c   : > { %2269 = vmatpush3.bf16.msra.mxu1 %v852_v48  ;;  %2270 = vmatprep.mubr.msk.bf16.mxu1 %vm2536_vm0, %v2535_v0  ;;  %v955_v1 = vsel %vm627_vm2, %v950_v59, 0 }
 0x39d   : > { %v748_v52 = vpack.c.bf16 %v746_v50, %v746_v50  ;;  %2280 = vmatprep.subr.bf16.mxu1 %v2535_v0  ;;  %v1126_v50 = vsel %vm754_vm3, %v2148_v49, 0 }
 0x39f   : > { %2265 = vmatmul.mubr.msk.bf16.vlgmr.msra.gmra.mrb[4].mxu0 %vm627_vm2, %v748_v52  ;;  %v948_v9 = vpop.permute.xlu1 %947 }
 0x3a0   : > { %2275 = vmatpush3.bf16.xpose.msra.mxu0 %v905_v53  ;;  %2276 = vmatprep.mubr.msk.bf16.mxu0 %vm2536_vm0, %v2535_v0 }
 0x3a1   : > { %2286 = vmatprep.subr.bf16.mxu0 %v2535_v0 }
 0x3a7   : > { %2277 = vmatmul.mubr.msk.bf16.vlgmr.msra.gmra.mrb[8].mxu0 %vm627_vm2, %v898_v54 }
 0x3a8   : > { %2288 = vmatprep.mubr.msk.bf16.mxu0 %vm2536_vm0, %v2535_v0 }
 0x46e   : > { %v792_v55 = vpop.f32.mrb[8].mxu1 }
 0x46f   : > { %v2260_v56 = vpop.f32.mrb[9].mxu1 }
 0x470   : > { %v795_v57 = vpop.f32.mrb[10].mxu1 }
 0x471   : > { %v2261_v58 = vpop.f32.mrb[11].mxu1 }
 0x472   : > { %v840_v60 = vpop.f32.mrb[4].mxu0 }
 0x473   : > { %v846_v61 = vpack.c.bf16 %v840_v60, %v792_v55  ;;  %v2266_v62 = vpop.f32.mrb[5].mxu0 }
 0x474   : > { %v843_v63 = vpop.f32.mrb[6].mxu0 }
 0x475   : > { %v2267_v2 = vpop.f32.mrb[7].mxu0  ;;  %2271 = vmatmul.mubr.msk.bf16.vlgmr.msra.gmra.mrb[12].mxu1 %vm627_vm2, %v846_v61 }
 0x476   : > { %2281 = vmatpush3.bf16.xpose.msra.mxu1 %v955_v1  ;;  %2282 = vmatprep.mubr.msk.bf16.mxu1 %vm2536_vm0, %v2535_v0 }
 0x477   : > { %2292 = vmatprep.subr.bf16.mxu1 %v2535_v0 }
 0x47a   : > { %v941_v5 = vpop.f32.mrb[8].mxu0 }
 0x47b   : > { %v997_v6 = vmul.f32 0.35355338, %v941_v5  ;;  %v2278_v8 = vpop.f32.mrb[9].mxu0 }
 0x47c   : > { %v944_v10 = vpop.f32.mrb[10].mxu0 }
 0x47d   : > { %v2279_v12 = vpop.f32.mrb[11].mxu0  ;;  %2283 = vmatmul.mubr.msk.bf16.vlgmr.msra.gmra.mrb[16].mxu1 %vm627_vm2, %v948_v9  ;;  %v999_v13 = vsel %vm627_vm2, %v997_v6, -inf }
 0x47e   : > { %1000 = vmax.xlane.f32.xlu1 %v999_v13  ;;  %2294 = vmatprep.mubr.msk.bf16.mxu1 %vm2536_vm0, %v2535_v0 }
 0x50b   : > { %v1001_v14 = vpop.xlane.xlu1 %1000 }
 0x50c   : > { %v1005_v15 = vsub.f32 %v997_v6, %v1001_v14 }
 0x50e   : > { %v1007_v16 = vmul.f32 1.442695, %v1005_v15  ;;  %v2138_v15 = vld [vmem:[%s3017_s24] ss:$0 sm:$0xff] }
 0x510   : > { %2434 = vpow2.f32 %v1007_v16 }
 0x51a   : > { %v2435_v17 = vpop.eup %2434 }
 0x51b   : > { %v1011_v18 = vsel %vm627_vm2, %v2435_v17, 0.0 }
 0x51c   : > { %1012 = vadd.xlane.f32.xlu1 %v1011_v18 }
 0x548   : > { %v2798_v19 = vpop.f32.mrb[12].mxu1 }
 0x549   : > { %v2272_v20 = vpop.f32.mrb[13].mxu1  ;;  %v895_v16 = vadd.f32 %v2138_v15, %v2798_v19 }
 0x54a   : > { %v2800_v21 = vpop.f32.mrb[14].mxu1 }
 0x54b   : > { %v2273_v22 = vpop.f32.mrb[15].mxu1  ;;  %v896_v18 = vadd.f32 %v2138_v15, %v2800_v21 }
 0x550   : > { %v991_v23 = vpop.f32.mrb[16].mxu1 }
 0x551   : > { %v998_v24 = vmul.f32 0.35355338, %v991_v23  ;;  %v2284_v25 = vpop.f32.mrb[17].mxu1 }
 0x552   : > { %v994_v26 = vpop.f32.mrb[18].mxu1 }
 0x553   : > { %v2285_v27 = vpop.f32.mrb[19].mxu1  ;;  %v1002_v28 = vsel %vm627_vm2, %v998_v24, -inf }
 0x554   : > { %1003 = vmax.xlane.f32.xlu0 %v1002_v28 }
 0x56a   : > { %1071 = vrot.lane.b32.xlu0 %v2745_v11, %s2541_s13 }
 0x56e   : > { %1171 = vrot.lane.b32.xlu0 %v2742_v7, %s2542_s2 }
 0x5a9   : > { %v1013_v36 = vpop.xlane.xlu1 %1012 }
 0x5e1   : > { %v1004_v29 = vpop.xlane.xlu0 %1003 }
 0x5e2   : > { %v1006_v30 = vsub.f32 %v998_v24, %v1004_v29 }
 0x5e4   : > { %v1009_v31 = vmul.f32 1.442695, %v1006_v30 }
 0x5e5   : > { %v1072_v32 = vpop.permute.xlu0 %1071 }
 0x5e6   : > { %2436 = vpow2.f32 %v1009_v31  ;;  %v1077_v33 = vsel %vm754_vm3, %v1072_v32, 0 }
 0x5e7   : > { %2293 = vmatpush3.bf16.msra.mxu1 %v1077_v33  ;;  %2438 = vrcp.f32 %v1013_v36 }
 0x5e8   : > { %2304 = vmatprep.subr.bf16.mxu1 %v2535_v0 }
 0x5e9   : > { %v1172_v48 = vpop.permute.xlu0 %1171 }
 0x5f0   : > { %v2437_v34 = vpop.eup %2436 }
 0x5f1   : > { %v1014_v35 = vsel %vm627_vm2, %v2437_v34, 0.0  ;;  %v2439_v37 = vpop.eup %2438 }
 0x5f2   : > { %1015 = vadd.xlane.f32.xlu1 %v1014_v35  ;;  %v1018_v39 = vmul.f32 %v2439_v37, %v2435_v17 }
 0x5f4   : > { %v1021_v42 = vpack.c.bf16 %v1018_v39, %v1018_v39 }
 0x603   : > { %1023 = vrot.lane.b32.xlu1 %v2742_v7, %s2541_s13  ;;  %s3018_s13 = scalar_lea.vmem %s2996_s4, %s2627_s23 }
 0x607   : > { %1173 = vrot.lane.b32.xlu1 %v2742_v7, %s2543_s16 }
 0x60b   : > { %1223 = vrot.lane.b32.xlu1 %v2745_v11, %s2543_s16 }
 0x60f   : > { %1221 = vrot.lane.b32.xlu1 %v2745_v11, %s2542_s2 }
 0x67f   : > { %v1016_v38 = vpop.xlane.xlu1 %1015 }
 0x680   : > { %2440 = vrcp.f32 %v1016_v38 }
 0x683   : > { %v1024_v40 = vpop.permute.xlu1 %1023 }
 0x684   : > { %v1029_v41 = vsel %vm754_vm3, %v1024_v40, 0 }
 0x685   : > { %2287 = vmatpush3.bf16.msra.mxu0 %v1029_v41  ;;  %v2154_v41 = vld [vmem:[%s2643_s17 + $0x8] sm:$0xf] }
 0x686   : > { %2298 = vmatprep.subr.bf16.mxu0 %v2535_v0 }
 0x687   : > { %v1174_v45 = vpop.permute.xlu1 %1173 }
 0x688   : > { %2289 = vmatmul.mubr.msk.bf16.vlgmr.msra.gmra.mrb[12].mxu0 %vm627_vm2, %v1021_v42  ;;  %v1179_v47 = vsel %vm627_vm2, %v1174_v45, 0  ;;  %v1400_v42 = vsel %vm754_vm3, %v2154_v41, 0 }
 0x689   : > { %2300 = vmatprep.mubr.msk.bf16.mxu0 %vm2536_vm0, %v2535_v0  ;;  %2299 = vmatpush3.bf16.msra.mxu0 %v1126_v50 }
 0x68a   : > { %v2441_v43 = vpop.eup %2440  ;;  %2310 = vmatprep.subr.bf16.mxu0 %v2535_v0 }
 0x68b   : > { %v1020_v44 = vmul.f32 %v2441_v43, %v2437_v34  ;;  %v1224_v55 = vpop.permute.xlu1 %1223 }
 0x68c   : > { %v1229_v60 = vsel %vm627_vm2, %v1224_v55, 0 }
 0x68d   : > { %v1022_v46 = vpack.c.bf16 %v1020_v44, %v1020_v44 }
 0x68f   : > { %2295 = vmatmul.mubr.msk.bf16.vlgmr.msra.gmra.mrb[20].mxu1 %vm627_vm2, %v1022_v46  ;;  %v1222_v2 = vpop.permute.xlu1 %1221 }
 0x690   : > { %2305 = vmatpush3.bf16.xpose.msra.mxu1 %v1179_v47  ;;  %2306 = vmatprep.mubr.msk.bf16.mxu1 %vm2536_vm0, %v2535_v0 }
 0x691   : > { %2316 = vmatprep.subr.bf16.mxu1 %v2535_v0 }
 0x697   : > { %2307 = vmatmul.mubr.msk.bf16.vlgmr.msra.gmra.mrb[24].mxu1 %vm627_vm2, %v1172_v48 }
 0x698   : > { %2318 = vmatprep.mubr.msk.bf16.mxu1 %vm2536_vm0, %v2535_v0 }
 0x75b   : > { %v1065_v51 = vpop.f32.mrb[12].mxu0 }
 0x75c   : > { %v2290_v52 = vpop.f32.mrb[13].mxu0 }
 0x75d   : > { %v1068_v53 = vpop.f32.mrb[14].mxu0 }
 0x75e   : > { %v2291_v54 = vpop.f32.mrb[15].mxu0 }
 0x762   : > { %v1113_v56 = vpop.f32.mrb[20].mxu1 }
 0x763   : > { %v1119_v57 = vpack.c.bf16 %v1113_v56, %v1065_v51  ;;  %v2296_v58 = vpop.f32.mrb[21].mxu1 }
 0x764   : > { %v1116_v59 = vpop.f32.mrb[22].mxu1 }
 0x765   : > { %v2297_v61 = vpop.f32.mrb[23].mxu1  ;;  %2301 = vmatmul.mubr.msk.bf16.vlgmr.msra.gmra.mrb[16].mxu0 %vm627_vm2, %v1119_v57 }
 0x766   : > { %2311 = vmatpush3.bf16.xpose.msra.mxu0 %v1229_v60  ;;  %2312 = vmatprep.mubr.msk.bf16.mxu0 %vm2536_vm0, %v2535_v0 }
 0x767   : > { %2322 = vmatprep.subr.bf16.mxu0 %v2535_v0 }
 0x76a   : > { %v1215_v62 = vpop.f32.mrb[24].mxu1 }
 0x76b   : > { %v1271_v63 = vmul.f32 0.35355338, %v1215_v62  ;;  %v2308_v1 = vpop.f32.mrb[25].mxu1 }
 0x76c   : > { %v1218_v5 = vpop.f32.mrb[26].mxu1 }
 0x76d   : > { %v2309_v6 = vpop.f32.mrb[27].mxu1  ;;  %2313 = vmatmul.mubr.msk.bf16.vlgmr.msra.gmra.mrb[20].mxu0 %vm627_vm2, %v1222_v2  ;;  %v1273_v8 = vsel %vm627_vm2, %v1271_v63, -inf }
 0x76e   : > { %1274 = vmax.xlane.f32.xlu0 %v1273_v8  ;;  %2324 = vmatprep.mubr.msk.bf16.mxu0 %vm2536_vm0, %v2535_v0 }
 0x7fb   : > { %v1275_v9 = vpop.xlane.xlu0 %1274 }
 0x7fc   : > { %v1279_v10 = vsub.f32 %v1271_v63, %v1275_v9 }
 0x7fe   : > { %v1281_v12 = vmul.f32 1.442695, %v1279_v10 }
 0x800   : > { %2442 = vpow2.f32 %v1281_v12 }
 0x80a   : > { %v2443_v13 = vpop.eup %2442 }
 0x80b   : > { %v1285_v14 = vsel %vm627_vm2, %v2443_v13, 0.0 }
 0x80c   : > { %1286 = vadd.xlane.f32.xlu0 %v1285_v14 }
 0x838   : > { %v1162_v17 = vpop.f32.mrb[16].mxu0 }
 0x839   : > { %v2845_v20 = vadd.f32 %v1162_v17, %v895_v16  ;;  %v2302_v22 = vpop.f32.mrb[17].mxu0 }
 0x83a   : > { %v1165_v23 = vpop.f32.mrb[18].mxu0 }
 0x83b   : > { %v2847_v24 = vadd.f32 %v1165_v23, %v896_v18  ;;  %v2303_v25 = vpop.f32.mrb[19].mxu0 }
 0x840   : > { %v1265_v26 = vpop.f32.mrb[20].mxu0 }
 0x841   : > { %v1272_v27 = vmul.f32 0.35355338, %v1265_v26  ;;  %v2314_v28 = vpop.f32.mrb[21].mxu0 }
 0x842   : > { %v1268_v29 = vpop.f32.mrb[22].mxu0 }
 0x843   : > { %v2315_v30 = vpop.f32.mrb[23].mxu0  ;;  %v1276_v31 = vsel %vm627_vm2, %v1272_v27, -inf }
 0x844   : > { %1277 = vmax.xlane.f32.xlu1 %v1276_v31 }
 0x855   : > { %1297 = vrot.lane.b32.xlu1 %v2742_v7, %s2544_s14 }
 0x859   : > { %1447 = vrot.lane.b32.xlu1 %v2742_v7, %s2545_s26 }
 0x85d   : > { %1497 = vrot.lane.b32.xlu1 %v2745_v11, %s2545_s26 }
 0x861   : > { %1495 = vrot.lane.b32.xlu1 %v2745_v11, %s2546_s28 }
 0x899   : > { %v1287_v19 = vpop.xlane.xlu0 %1286 }
 0x89a   : > { %2444 = vrcp.f32 %v1287_v19 }
 0x8a4   : > { %v2445_v21 = vpop.eup %2444 }
 0x8a5   : > { %v1292_v34 = vmul.f32 %v2445_v21, %v2443_v13 }
 0x8a7   : > { %v1295_v38 = vpack.c.bf16 %v1292_v34, %v1292_v34 }
 0x8d1   : > { %v1278_v32 = vpop.xlane.xlu1 %1277 }
 0x8d2   : > { %v1280_v33 = vsub.f32 %v1272_v27, %v1278_v32 }
 0x8d4   : > { %v1283_v35 = vmul.f32 1.442695, %v1280_v33 }
 0x8d5   : > { %v1298_v36 = vpop.permute.xlu1 %1297 }
 0x8d6   : > { %2446 = vpow2.f32 %v1283_v35  ;;  %v1303_v37 = vsel %vm754_vm3, %v1298_v36, 0 }
 0x8d7   : > { %2317 = vmatpush3.bf16.msra.mxu1 %v1303_v37 }
 0x8d8   : > { %2328 = vmatprep.subr.bf16.mxu1 %v2535_v0 }
 0x8d9   : > { %v1448_v48 = vpop.permute.xlu1 %1447 }
 0x8da   : > { %2319 = vmatmul.mubr.msk.bf16.vlgmr.msra.gmra.mrb[28].mxu1 %vm627_vm2, %v1295_v38  ;;  %v1453_v50 = vsel %vm627_vm2, %v1448_v48, 0  ;;  %v2160_v38 = vld [vmem:[%s2643_s17 + $0xc] sm:$0xf] }
 0x8db   : > { %2330 = vmatprep.mubr.msk.bf16.mxu1 %vm2536_vm0, %v2535_v0  ;;  %2329 = vmatpush3.bf16.msra.mxu1 %v1400_v42 }
 0x8dc   : > { %2340 = vmatprep.subr.bf16.mxu1 %v2535_v0 }
 0x8dd   : > { %v1498_v56 = vpop.permute.xlu1 %1497 }
 0x8de   : > { %v1503_v61 = vsel %vm627_vm2, %v1498_v56, 0 }
 0x8e0   : > { %v2447_v39 = vpop.eup %2446 }
 0x8e1   : > { %v1288_v40 = vsel %vm627_vm2, %v2447_v39, 0.0  ;;  %v1496_v5 = vpop.permute.xlu1 %1495 }
 0x8e2   : > { %1289 = vadd.xlane.f32.xlu0 %v1288_v40 }
 0x8f8   : > { %1345 = vrot.lane.b32.xlu0 %v2745_v11, %s2544_s14 }
 0x8fc   : > { %1445 = vrot.lane.b32.xlu0 %v2742_v7, %s2546_s28 }
 0x96f   : > { %v1290_v43 = vpop.xlane.xlu0 %1289 }
 0x970   : > { %2448 = vrcp.f32 %v1290_v43 }
 0x973   : > { %v1346_v44 = vpop.permute.xlu0 %1345 }
 0x974   : > { %v1351_v45 = vsel %vm754_vm3, %v1346_v44, 0 }
 0x975   : > { %2323 = vmatpush3.bf16.msra.mxu0 %v1351_v45 }
 0x976   : > { %2334 = vmatprep.subr.bf16.mxu0 %v2535_v0 }
 0x977   : > { %v1446_v51 = vpop.permute.xlu0 %1445 }
 0x97a   : > { %v2449_v46 = vpop.eup %2448 }
 0x97b   : > { %v1294_v47 = vmul.f32 %v2449_v46, %v2447_v39  ;;  %v1674_v39 = vsel %vm754_vm3, %v2160_v38, 0 }
 0x97d   : > { %v1296_v49 = vpack.c.bf16 %v1294_v47, %v1294_v47 }
 0x97f   : > { %2325 = vmatmul.mubr.msk.bf16.vlgmr.msra.gmra.mrb[24].mxu0 %vm627_vm2, %v1296_v49 }
 0x980   : > { %2335 = vmatpush3.bf16.xpose.msra.mxu0 %v1453_v50  ;;  %2336 = vmatprep.mubr.msk.bf16.mxu0 %vm2536_vm0, %v2535_v0 }
 0x981   : > { %2346 = vmatprep.subr.bf16.mxu0 %v2535_v0 }
 0x987   : > { %2337 = vmatmul.mubr.msk.bf16.vlgmr.msra.gmra.mrb[28].mxu0 %vm627_vm2, %v1446_v51 }
 0x988   : > { %2348 = vmatprep.mubr.msk.bf16.mxu0 %vm2536_vm0, %v2535_v0 }
 0x9ad   : > { %v1339_v52 = vpop.f32.mrb[28].mxu1 }
 0x9ae   : > { %v2320_v53 = vpop.f32.mrb[29].mxu1 }
 0x9af   : > { %v1342_v54 = vpop.f32.mrb[30].mxu1 }
 0x9b0   : > { %v2321_v55 = vpop.f32.mrb[31].mxu1 }
 0xa52   : > { %v1387_v57 = vpop.f32.mrb[24].mxu0 }
 0xa53   : > { %v1393_v58 = vpack.c.bf16 %v1387_v57, %v1339_v52  ;;  %v2326_v59 = vpop.f32.mrb[25].mxu0 }
 0xa54   : > { %v1390_v60 = vpop.f32.mrb[26].mxu0 }
 0xa55   : > { %v2327_v62 = vpop.f32.mrb[27].mxu0  ;;  %2331 = vmatmul.mubr.msk.bf16.vlgmr.msra.gmra.mrb[32].mxu1 %vm627_vm2, %v1393_v58 }
 0xa56   : > { %2341 = vmatpush3.bf16.xpose.msra.mxu1 %v1503_v61  ;;  %2342 = vmatprep.mubr.msk.bf16.mxu1 %vm2536_vm0, %v2535_v0 }
 0xa57   : > { %2352 = vmatprep.subr.bf16.mxu1 %v2535_v0 }
 0xa5a   : > { %v1489_v63 = vpop.f32.mrb[28].mxu0 }
 0xa5b   : > { %v1545_v1 = vmul.f32 0.35355338, %v1489_v63  ;;  %v2338_v2 = vpop.f32.mrb[29].mxu0 }
 0xa5c   : > { %v1492_v6 = vpop.f32.mrb[30].mxu0 }
 0xa5d   : > { %v2339_v8 = vpop.f32.mrb[31].mxu0  ;;  %2343 = vmatmul.mubr.msk.bf16.vlgmr.msra.gmra.mrb[36].mxu1 %vm627_vm2, %v1496_v5  ;;  %v1547_v9 = vsel %vm627_vm2, %v1545_v1, -inf }
 0xa5e   : > { %1548 = vmax.xlane.f32.xlu0 %v1547_v9  ;;  %2354 = vmatprep.mubr.msk.bf16.mxu1 %vm2536_vm0, %v2535_v0 }
 0xaeb   : > { %v1549_v10 = vpop.xlane.xlu0 %1548 }
 0xaec   : > { %v1553_v12 = vsub.f32 %v1545_v1, %v1549_v10 }
 0xaee   : > { %v1555_v13 = vmul.f32 1.442695, %v1553_v12 }
 0xaf0   : > { %2450 = vpow2.f32 %v1555_v13  ;;  %v2420_v13 = vld [vmem:[%s2656_s12] sm:$0xff]  }
 0xafa   : > { %v2451_v14 = vpop.eup %2450 }
 0xafb   : > { %v1559_v15 = vsel %vm627_vm2, %v2451_v14, 0.0 }
 0xafc   : > { %1560 = vadd.xlane.f32.xlu0 %v1559_v15  ;;  %v2422_v15 = vld [vmem:[%s2670_s20] sm:$0xff]  }
 0xb28   : > { %v1436_v16 = vpop.f32.mrb[32].mxu1 }
 0xb29   : > { %v1443_v17 = vadd.f32 %v1436_v16, %v2845_v20  ;;  %v2332_v18 = vpop.f32.mrb[33].mxu1  ;;  %v2423_v16 = vld [vmem:[%s2670_s20 + $0x8] sm:$0xff]  }
 0xb2a   : > { %v1439_v22 = vpop.f32.mrb[34].mxu1 }
 0xb2b   : > { %v1444_v23 = vadd.f32 %v1439_v22, %v2847_v24  ;;  %v2333_v25 = vpop.f32.mrb[35].mxu1 }
 0xb30   : > { %v1539_v26 = vpop.f32.mrb[36].mxu1 }
 0xb31   : > { %v1546_v27 = vmul.f32 0.35355338, %v1539_v26  ;;  %v2344_v28 = vpop.f32.mrb[37].mxu1 }
 0xb32   : > { %v1542_v29 = vpop.f32.mrb[38].mxu1  ;;  %v2162_v28 = vld [vmem:[%s3018_s13] ss:$0 sm:$0xff] }
 0xb33   : > { %v2345_v30 = vpop.f32.mrb[39].mxu1  ;;  %v1550_v31 = vsel %vm627_vm2, %v1546_v27, -inf }
 0xb34   : > { %1551 = vmax.xlane.f32.xlu1 %v1550_v31 }
 0xb45   : > { %1571 = vrot.lane.b32.xlu1 %v2742_v7, %s2547_s30 }
 0xb89   : > { %v1561_v19 = vpop.xlane.xlu0 %1560 }
 0xb8a   : > { %2452 = vrcp.f32 %v1561_v19 }
 0xb94   : > { %v2453_v21 = vpop.eup %2452 }
 0xb95   : > { %v1566_v33 = vmul.f32 %v2453_v21, %v2451_v14  ;;  %v2421_v14 = vld [vmem:[%s2656_s12 + $0x8] sm:$0xff]   ;;  %v2163_v21 = vld [vmem:[%s3019_s15] ss:$0 sm:$0xff] }
 0xb97   : > { %v1569_v36 = vpack.c.bf16 %v1566_v33, %v1566_v33 }
 0xbc1   : > { %v1552_v20 = vpop.xlane.xlu1 %1551 }
 0xbc2   : > { %v1554_v32 = vsub.f32 %v1546_v27, %v1552_v20 }
 0xbc4   : > { %v1557_v24 = vmul.f32 1.442695, %v1554_v32 }
 0xbc5   : > { %v1572_v34 = vpop.permute.xlu1 %1571 }
 0xbc6   : > { %2454 = vpow2.f32 %v1557_v24  ;;  %v1577_v35 = vsel %vm754_vm3, %v1572_v34, 0  ;;  %v2424_v34 = vld [vmem:[%s2670_s20 + $0x10] sm:$0xff]  }
 0xbc7   : > { %2347 = vmatpush3.bf16.msra.mxu0 %v1577_v35  ;;  %v2425_v35 = vld [vmem:[%s2670_s20 + $0x18] sm:$0xff]   ;;  %s3020_s20 = scalar_lea.vmem %s3001_s9, %s2627_s23 }
 0xbc8   : > { %2358 = vmatprep.subr.bf16.mxu0 %v2535_v0 }
 0xbca   : > { %2349 = vmatmul.mubr.msk.bf16.vlgmr.msra.gmra.mrb[32].mxu0 %vm627_vm2, %v1569_v36  ;;  %v2164_v36 = vld [vmem:[%s517_s1] ss:$0 sm:$0xff] }
 0xbcb   : > { %2360 = vmatprep.mubr.msk.bf16.mxu0 %vm2536_vm0, %v2535_v0  ;;  %2359 = vmatpush3.bf16.msra.mxu0 %v1674_v39 }
 0xbcc   : > { %2372 = vmatprep.subr.bf16.mxu0 %v2535_v0 }
 0xbd0   : > { %v2455_v7 = vpop.eup %2454 }
 0xbd1   : > { %v1562_v37 = vsel %vm627_vm2, %v2455_v7, 0.0 }
 0xbd2   : > { %1563 = vadd.xlane.f32.xlu0 %v1562_v37 }
 0xbe8   : > { %1619 = vrot.lane.b32.xlu0 %v2745_v11, %s2547_s30 }
 0xc5f   : > { %v1564_v40 = vpop.xlane.xlu0 %1563 }
 0xc60   : > { %2456 = vrcp.f32 %v1564_v40 }
 0xc63   : > { %v1620_v41 = vpop.permute.xlu0 %1619 }
 0xc64   : > { %v1625_v42 = vsel %vm754_vm3, %v1620_v41, 0 }
 0xc65   : > { %2353 = vmatpush3.bf16.msra.mxu1 %v1625_v42 }
 0xc66   : > { %2364 = vmatprep.subr.bf16.mxu1 %v2535_v0 }
 0xc6a   : > { %v2457_v43 = vpop.eup %2456 }
 0xc6b   : > { %v1568_v44 = vmul.f32 %v2457_v43, %v2455_v7 }
 0xc6d   : > { %v1570_v45 = vpack.c.bf16 %v1568_v44, %v1568_v44 }
 0xc6f   : > { %2355 = vmatmul.mubr.msk.bf16.vlgmr.msra.gmra.mrb[40].mxu1 %vm627_vm2, %v1570_v45 }
 0xc70   : > { %2368 = vmatprep.mubr.msk.bf16.mxu1 %vm2536_vm0, %v2535_v0  ;;  %2365 = vmatpush3.bf16.msra.mxu1 %v2420_v13  ;;  %v2175_v13 = vld [vmem:[%s531_s27] ss:$0 sm:$0xff] }
 0xc71   : > { %2366 = vmatprep.subr.bf16.mxu1 %v2535_v0 }
 0xc74   : > { %2367 = vmatpush3.bf16.msra.mxu1 %v2421_v14 }
 0xc9d   : > { %v1613_v11 = vpop.f32.mrb[32].mxu0 }
 0xc9e   : > { %v2350_v46 = vpop.f32.mrb[33].mxu0 }
 0xc9f   : > { %v1616_v47 = vpop.f32.mrb[34].mxu0 }
 0xca0   : > { %v2351_v48 = vpop.f32.mrb[35].mxu0 }
 0xd42   : > { %v1661_v49 = vpop.f32.mrb[40].mxu1 }
 0xd43   : > { %v1667_v50 = vpack.c.bf16 %v1661_v49, %v1613_v11  ;;  %v2356_v51 = vpop.f32.mrb[41].mxu1 }
 0xd44   : > { %v1664_v52 = vpop.f32.mrb[42].mxu1 }
 0xd45   : > { %v2357_v53 = vpop.f32.mrb[43].mxu1  ;;  %2361 = vmatmul.mubr.msk.bf16.vlgmr.msra.gmra.mrb[36].mxu0 %vm627_vm2, %v1667_v50 }
 0xd46   : > { %2380 = vmatprep.mubr.msk.bf16.mxu0 %vm2536_vm0, %v2535_v0  ;;  %2373 = vmatpush3.bf16.msra.mxu0 %v2422_v15 }
 0xd47   : > { %2374 = vmatprep.subr.bf16.mxu0 %v2535_v0 }
 0xd4a   : > { %2375 = vmatpush3.bf16.msra.mxu0 %v2423_v16 }
 0xd4b   : > { %2376 = vmatprep.subr.bf16.mxu0 %v2535_v0 }
 0xd4e   : > { %2377 = vmatpush3.bf16.msra.mxu0 %v2424_v34 }
 0xd4f   : > { %2378 = vmatprep.subr.bf16.mxu0 %v2535_v0  ;;  %v2168_v0 = vld [vmem:[%s3020_s20] ss:$0 sm:$0xff] }
 0xd52   : > { %2379 = vmatpush3.bf16.msra.mxu0 %v2425_v35 }
 0xe18   : > { %v1710_v54 = vpop.f32.mrb[36].mxu0 }
 0xe19   : > { %v1717_v55 = vadd.f32 %v1710_v54, %v1443_v17  ;;  %v2362_v56 = vpop.f32.mrb[37].mxu0 }
 0xe1a   : > { %v1713_v57 = vpop.f32.mrb[38].mxu0 }
 0xe1b   : > { %v1718_v58 = vadd.f32 %v1713_v57, %v1444_v23  ;;  %v2363_v59 = vpop.f32.mrb[39].mxu0  ;;  %v1719_v60 = vadd.f32 %v1717_v55, %v2731_v3 }
 0xe1d   : > { %v1723_v61 = vsel %vm570_vm1, %v1719_v60, 0.0  ;;  %v1720_v62 = vadd.f32 %v1718_v58, %v2733_v4 }
 0xe1e   : > { %1724 = vadd.xlane.f32.xlu1 %v1723_v61 }
 0xe1f   : > { %v1726_v63 = vsel %vm570_vm1, %v1720_v62, 0.0 }
 0xe20   : > { %1727 = vadd.xlane.f32.xlu0 %v1726_v63 }
 0xeab   : > { %v1725_v1 = vpop.xlane.xlu1 %1724 }
 0xeac   : > { %v1730_v2 = vmul.f32 0.03125, %v1725_v1 }
 0xead   : > { %v1728_v5 = vpop.xlane.xlu0 %1727 }
 0xeae   : > { %v1732_v6 = vsub.f32 %v1719_v60, %v1730_v2  ;;  %v1731_v8 = vmul.f32 0.03125, %v1728_v5 }
 0xeb0   : > { %v1733_v9 = vsub.f32 %v1720_v62, %v1731_v8  ;;  %v1734_v10 = vmul.f32 %v1732_v6, %v1732_v6 }
 0xeb2   : > { %v1736_v3 = vsel %vm570_vm1, %v1734_v10, 0.0  ;;  %v1735_v12 = vmul.f32 %v1733_v9, %v1733_v9 }
 0xeb3   : > { %1737 = vadd.xlane.f32.xlu1 %v1736_v3  ;;  %v2174_v3 = vld [vmem:[%s528_s29] ss:$0 sm:$0xff] }
 0xeb4   : > { %v1739_v4 = vsel %vm570_vm1, %v1735_v12, 0.0 }
 0xeb5   : > { %1740 = vadd.xlane.f32.xlu0 %v1739_v4 }
 0xf40   : > { %v1738_v17 = vpop.xlane.xlu1 %1737 }
 0xf41   : > { %v1742_v18 = vmul.f32 0.03125, %v1738_v17 }
 0xf42   : > { %v1741_v22 = vpop.xlane.xlu0 %1740 }
 0xf43   : > { %v1744_v23 = vadd.f32 1e-05, %v1742_v18  ;;  %v1743_v25 = vmul.f32 0.03125, %v1741_v22 }
 0xf45   : > { %2458 = vrsqrt.f32 %v1744_v23  ;;  %v1745_v26 = vadd.f32 1e-05, %v1743_v25 }
 0xf47   : > { %2460 = vrsqrt.f32 %v1745_v26 }
 0xf4f   : > { %v2459_v27 = vpop.eup %2458 }
 0xf50   : > { %v1748_v29 = vmul.f32 %v2459_v27, %v1732_v6 }
 0xf51   : > { %v2461_v30 = vpop.eup %2460 }
 0xf52   : > { %v1756_v31 = vmul.f32 %v2162_v28, %v1748_v29  ;;  %v1749_v19 = vmul.f32 %v2461_v30, %v1733_v9 }
 0xf54   : > { %v1757_v20 = vmul.f32 %v2162_v28, %v1749_v19  ;;  %v1764_v32 = vadd.f32 %v2163_v21, %v1756_v31 }
 0xf56   : > { %v1765_v33 = vadd.f32 %v2163_v21, %v1757_v20 }
 0xf58   : > { %v1766_v24 = vpack.c.bf16 %v1765_v33, %v1764_v32 }
 0xf5a   : > { %2369 = vmatmul.mubr.msk.bf16.vlgmr.msra.gmra.mrb[44].mxu1 %vm570_vm1, %v1766_v24 }
0x102d   : > { %v1827_v7 = vpop.f32.mrb[44].mxu1 }
0x102e   : > { %v1828_v37 = vadd.f32 %v2164_v36, %v1827_v7  ;;  %v2370_v38 = vpop.f32.mrb[45].mxu1 }
0x102f   : > { %v1830_v39 = vpop.f32.mrb[46].mxu1 }
0x1030   : > { %v1831_v40 = vadd.f32 %v2164_v36, %v1830_v39  ;;  %v2371_v41 = vpop.f32.mrb[47].mxu1  ;;  %v1834_v42 = vmax.f32 %v1828_v37, 0.0 }
0x1032   : > { %v1835_v43 = vmax.f32 %v1831_v40, 0.0 }
0x1034   : > { %v1836_v44 = vpack.c.bf16 %v1835_v43, %v1834_v42 }
0x1036   : > { %2381 = vmatmul.mubr.msk.bf16.vlgmr.msra.gmra.mrb[40].mxu0 %vm1876_vm4, %v1836_v44 }
0x1109   : > { %v1914_v45 = vpop.f32.mrb[40].mxu0 }
0x110a   : > { %v1915_v11 = vadd.f32 %v2168_v0, %v1914_v45  ;;  %v2382_v46 = vpop.f32.mrb[41].mxu0 }
0x110b   : > { %v1917_v47 = vpop.f32.mrb[42].mxu0 }
0x110c   : > { %v1918_v48 = vadd.f32 %v2168_v0, %v1917_v47  ;;  %v2383_v49 = vpop.f32.mrb[43].mxu0  ;;  %v1921_v50 = vadd.f32 %v1915_v11, %v1764_v32 }
0x110e   : > { %v1925_v51 = vsel %vm570_vm1, %v1921_v50, 0.0  ;;  %v1922_v52 = vadd.f32 %v1918_v48, %v1765_v33 }
0x110f   : > { %1926 = vadd.xlane.f32.xlu1 %v1925_v51 }
0x1110   : > { %v1928_v53 = vsel %vm570_vm1, %v1922_v52, 0.0 }
0x1111   : > { %1929 = vadd.xlane.f32.xlu0 %v1928_v53 }
0x119c   : > { %v1927_v54 = vpop.xlane.xlu1 %1926 }
0x119d   : > { %v1931_v55 = vmul.f32 0.03125, %v1927_v54 }
0x119e   : > { %v1930_v56 = vpop.xlane.xlu0 %1929 }
0x119f   : > { %v1933_v57 = vsub.f32 %v1921_v50, %v1931_v55  ;;  %v1932_v58 = vmul.f32 0.03125, %v1930_v56 }
0x11a1   : > { %v1934_v59 = vsub.f32 %v1922_v52, %v1932_v58  ;;  %v1935_v60 = vmul.f32 %v1933_v57, %v1933_v57 }
0x11a3   : > { %v1937_v61 = vsel %vm570_vm1, %v1935_v60, 0.0  ;;  %v1936_v62 = vmul.f32 %v1934_v59, %v1934_v59 }
0x11a4   : > { %1938 = vadd.xlane.f32.xlu1 %v1937_v61 }
0x11a5   : > { %v1940_v63 = vsel %vm570_vm1, %v1936_v62, 0.0 }
0x11a6   : > { %1941 = vadd.xlane.f32.xlu0 %v1940_v63 }
0x1231   : > { %v1939_v1 = vpop.xlane.xlu1 %1938 }
0x1232   : > { %v1943_v2 = vmul.f32 0.03125, %v1939_v1 }
0x1233   : > { %v1942_v5 = vpop.xlane.xlu0 %1941 }
0x1234   : > { %v1945_v6 = vadd.f32 1e-05, %v1943_v2  ;;  %v1944_v8 = vmul.f32 0.03125, %v1942_v5 }
0x1236   : > { %2462 = vrsqrt.f32 %v1945_v6  ;;  %v1946_v9 = vadd.f32 1e-05, %v1944_v8 }
0x1238   : > { %2464 = vrsqrt.f32 %v1946_v9 }
0x1240   : > { %v2463_v10 = vpop.eup %2462 }
0x1241   : > { %v1949_v12 = vmul.f32 %v2463_v10, %v1933_v57 }
0x1242   : > { %v2465_v4 = vpop.eup %2464 }
0x1243   : > { %v1957_v14 = vmul.f32 %v2174_v3, %v1949_v12  ;;  %v1950_v15 = vmul.f32 %v2465_v4, %v1934_v59 }
0x1245   : > { %v1965_v16 = vadd.f32 %v2175_v13, %v1957_v14  ;;  %v1958_v17 = vmul.f32 %v2174_v3, %v1950_v15 }
0x1247   : > { %1967 = vst.msk [vmem:[#allocation3] sm:$0xff] %vm570_vm1, %v1965_v16  ;;  %v1966_v18 = vadd.f32 %v2175_v13, %v1958_v17 }
0x1249   : > { %1968 = vst.msk [vmem:[#allocation3 + $0x8] sm:$0xff] %vm570_vm1, %v1966_v18 }
0x124a   : > { %2505 = shalt.err (!%p2502_p6)
}
0x124b   : > { %s3021_s27 = sld [smem:[#allocation15_spill]] }
0x1251   : > { %s2506_s12 = scalar_lea.hbm %s3021_s27, 256 }
0x1252   : > { %p2507_p7 = scmp.ne.s32.totalorder %s3021_s27, %s2506_s12  ;;  %p2512_p10 = scmp.lt.u32.totalorder %s2506_s12, %s3021_s27 }
0x1254   : > { %p2508_p8 = pnand %p2507_p7, %p2392_p3 }
0x1256   : > { %p2509_p9 = pneg %p2508_p8 }
0x1258   : > { %p2514_p11 = pnand %p2512_p10, %p2509_p9 }
0x125a   : > { %2517 = shalt.err (!%p2514_p11)
}
0x125b   : > { %s2548_s19 = smov 128   ;;  %s2549_s3 = smov 8  }
0x125c   : > { %2388 = dma.vmem_to_hbm [thread:$0]  (%p2392_p3), %s2680_s25, 256, %s3021_s27, [#allocation4], %s2548_s19, %s2548_s19, %s2549_s3  }
0x125d   : > { %2527 = dma.done.wait (%p2392_p3), [#allocation4], 256  }
0x125e   : > { %2529 = vsyncadd (%p2392_p3), [#allocation4], 4294967040 }
0x125f PF: > { %s3022_s21 = sld [smem:[#allocation11_spill]] }
0x1265   : > { %s23_s21 = sadd.s32 1, %s3022_s21  }
0x1266   : > { %p20_p12 = scmp.ge.s32.totalorder %s23_s21, 4  }
0x1268   :  { %22 = sbr.rel (!%p20_p12) target bundleno = 6 (0x6), region = 132 }
0x126f   :  { %1991 = vsyncpa [#allocation4], 1 }
0x1270   :  { %1993 = vsyncpa [#allocation4 + $0x1], 1 }
0x1271   :  { %1994 = vsyncmov [#allocation2] }
0x1274   :  { %s1995_s24 = vpop.sfrf %1994 }
0x1275   :  { %p2180_p13 = scmp.ne.s32.totalorder %s1995_s24, 0 }
0x1277   :  { %1999 = shalt.err (%p2180_p13)  }

</bundles_post_ra>
